<compile_context>
chip_gen: v7x
topology: tpu7x:2x2x1
jax: 0.10.0
libtpu: 0.0.40
codegen_flags: <defaults>
</compile_context>

<pallas_src>
import functools

import jax
import jax.numpy as jnp
import numpy as np
from jax.experimental import pallas as pl
from jax.experimental.pallas import tpu as pltpu

EPS = 1e-5


# ----------------------------- Pallas kernels ------------------------------ #

def _bn_relu_gemm_bn_relu_kernel(x_ref, w_ref, s1_ref, b1_ref, s2_ref, b2_ref,
                                 o_ref):
    """out = relu( bn2( relu(bn1(x)) @ W1 ) )  — BN affines folded to scale/bias.

    MXU operands are bf16 (weight pre-cast in the wrapper, activation cast after
    the f32 prologue); accumulation and the epilogue stay f32.
    """
    t = jnp.maximum(x_ref[...] * s1_ref[...] + b1_ref[...], 0.0)      # f32 BN1+ReLU
    acc = jnp.dot(t.astype(jnp.bfloat16), w_ref[...],
                  preferred_element_type=jnp.float32)                 # bf16 MXU, f32 acc
    acc = jnp.maximum(acc * s2_ref[...] + b2_ref[...], 0.0)           # f32 BN2+ReLU
    o_ref[...] = acc.astype(o_ref.dtype)


def _conv3x3_tap_kernel(x_ref, w_ref, o_ref, *, wp, mo):
    """3x3 conv (stride 1, pad 1) as 9 accumulated GEMM taps.

    x_ref: (1, (H+6)*(W+2), C)  padded image flattened over rows (in VMEM).
    w_ref: (9, C, Cg)           bf16 tap weights (resident).
    o_ref: (1, (H+2)*(W+2), Cg) conv output on the padded grid; the wrapper
                                discards the 1-pixel garbage border.
    Each tap reads a constant-offset contiguous row-slice of the flattened
    image, so the K-reduction over the 3x3 window needs no im2col buffer.
    """
    cg = o_ref.shape[-1]
    acc = jnp.zeros((mo, cg), jnp.float32)
    for t in range(9):
        di, dj = t // 3, t % 3
        off = (di + 1) * wp + dj - 1                    # static, always in-bounds
        xt = x_ref[0, off:off + mo, :].astype(jnp.bfloat16)
        acc = acc + jnp.dot(xt, w_ref[t], preferred_element_type=jnp.float32)
    o_ref[0] = acc.astype(o_ref.dtype)


# ------------------------------ tile selection ------------------------------ #

def _choose_tm(m, k, n, vmem_budget_bytes=12 << 20):
    """Row-tile that is sublane/MXU aligned and VMEM-bounded (cdiv gridding).

    Budget is conservative w.r.t. v7x's 64 MiB physical VMEM: double-buffered
    activation/output tiles + single resident weight/scale must fit.
    """
    m8 = ((m + 7) // 8) * 8
    tm = 256                                  # 256-aligned: fills v5e/v6e MXU tiles
    while tm > 8:
        vmem = 2 * tm * (k + n) * 4 + 2 * k * n + 16 * (k + n)
        if vmem <= vmem_budget_bytes:
            break
        tm //= 2
    if m8 <= tm:                              # tiny M -> single full block
        tm = m8
    m_pad = ((m + tm - 1) // tm) * tm
    return tm, m_pad


# ------------------------------ pallas wrappers ----------------------------- #

def bn_relu_gemm_bn_relu(x2d, w_bf16, s1, b1, s2, b2):
    """relu(bn2(relu(bn1(x2d)) @ w)) with row tiling; pads M, slices it back."""
    m, k = x2d.shape
    _, ncol = w_bf16.shape
    tm, m_pad = _choose_tm(m, k, ncol)
    if m_pad != m:
        x2d = jnp.pad(x2d, ((0, m_pad - m), (0, 0)))   # padded rows are discarded

    s1r = s1.reshape(1, k).astype(jnp.float32)
    b1r = b1.reshape(1, k).astype(jnp.float32)
    s2r = s2.reshape(1, ncol).astype(jnp.float32)
    b2r = b2.reshape(1, ncol).astype(jnp.float32)

    flops = 2 * m_pad * k * ncol
    bytes_accessed = 4 * m_pad * (k + ncol) + 2 * k * ncol + 16 * (k + ncol)

    out = pl.pallas_call(
        _bn_relu_gemm_bn_relu_kernel,
        out_shape=jax.ShapeDtypeStruct((m_pad, ncol), jnp.float32),
        grid=(m_pad // tm,),
        in_specs=[
            pl.BlockSpec((tm, k), lambda i: (i, 0)),
            pl.BlockSpec((k, ncol), lambda i: (0, 0)),
            pl.BlockSpec((1, k), lambda i: (0, 0)),
            pl.BlockSpec((1, k), lambda i: (0, 0)),
            pl.BlockSpec((1, ncol), lambda i: (0, 0)),
            pl.BlockSpec((1, ncol), lambda i: (0, 0)),
        ],
        out_specs=pl.BlockSpec((tm, ncol), lambda i: (i, 0)),
        compiler_params=pltpu.CompilerParams(
            dimension_semantics=("parallel",)),
        cost_estimate=pl.CostEstimate(flops=flops, transcendentals=0,
                                      bytes_accessed=bytes_accessed),
    )(x2d, w_bf16, s1r, b1r, s2r, b2r)
    return out[:m]


def conv3x3(t2_nhwc, w_oihw):
    """3x3 conv, stride 1, pad 1, no bias — per-image 9-tap Pallas kernel."""
    n, h, w, c = t2_nhwc.shape
    cg = w_oihw.shape[0]
    wp = w + 2
    l_rows = (h + 6) * wp            # H padded by 3/3, W by 1/1 (keeps taps in-bounds)
    mo = (h + 2) * wp                # conv evaluated on the padded grid

    xp = jnp.pad(t2_nhwc, ((0, 0), (3, 3), (1, 1), (0, 0)))
    xin = xp.reshape(n, l_rows, c)
    wt = jnp.transpose(w_oihw, (2, 3, 1, 0)).reshape(9, c, cg).astype(jnp.bfloat16)

    flops = 2 * n * 9 * mo * c * cg
    bytes_accessed = 4 * n * (l_rows * c + mo * cg) + 2 * 9 * c * cg

    out = pl.pallas_call(
        functools.partial(_conv3x3_tap_kernel, wp=wp, mo=mo),
        out_shape=jax.ShapeDtypeStruct((n, mo, cg), jnp.float32),
        grid=(n,),
        in_specs=[pl.BlockSpec((1, l_rows, c), lambda i: (i, 0, 0)),
                  pl.BlockSpec((9, c, cg), lambda i: (0, 0, 0))],
        out_specs=pl.BlockSpec((1, mo, cg), lambda i: (i, 0, 0)),
        compiler_params=pltpu.CompilerParams(
            dimension_semantics=("parallel",)),
        cost_estimate=pl.CostEstimate(flops=flops, transcendentals=0,
                                      bytes_accessed=bytes_accessed),
    )(xin, wt)

    yfull = out.reshape(n, h + 2, wp, cg)
    return yfull[:, 1:h + 1, 1:w + 1, :]      # drop 1-pixel garbage border


# ------------------------------- JAX glue ---------------------------------- #

def _fold_bn(gamma, beta, mean, var):
    scale = gamma / jnp.sqrt(var + EPS)
    bias = beta - mean * scale
    return scale, bias


def _conv1x1_weight_to_gemm(w):
    """PyTorch OIHW 1x1 conv weight -> (Cin, Cout) GEMM matrix (bf16)."""
    cout, cin, _, _ = w.shape
    return jnp.transpose(w.reshape(cout, cin), (1, 0)).astype(jnp.bfloat16)


def dense_bottleneck_forward(x_nchw, p):
    x = jnp.transpose(x_nchw, (0, 2, 3, 1))            # NCHW -> NHWC
    n, h, w, cin = x.shape
    cinner = p["w1"].shape[0]

    s1, b1 = _fold_bn(*p["bn1"])
    s2, b2 = _fold_bn(*p["bn2"])

    # stage 1: BN1 -> ReLU -> 1x1 conv -> BN2 -> ReLU  (single fused GEMM kernel)
    t2_2d = bn_relu_gemm_bn_relu(x.reshape(n * h * w, cin),
                                 _conv1x1_weight_to_gemm(p["w1"]),
                                 s1, b1, s2, b2)
    t2 = t2_2d.reshape(n, h, w, cinner)

    # stage 2: 3x3 conv (9-tap in-kernel reduction, no im2col)
    y2 = conv3x3(t2, p["w2"])                           # (n, h, w, growth_rate)

    out = jnp.concatenate([x, y2], axis=-1)             # [shortcut(x), residual(x)]
    return jnp.transpose(out, (0, 3, 1, 2))             # NHWC -> NCHW


# -------------------------- pure-JAX reference ----------------------------- #

def _ref_bn(x, bn):
    gamma, beta, mean, var = bn
    inv = gamma / jnp.sqrt(var + EPS)
    return (x - mean[None, :, None, None]) * inv[None, :, None, None] \
        + beta[None, :, None, None]


def _ref_conv(x, w, pad):
    return jax.lax.conv_general_dilated(
        x, w, (1, 1), [(pad, pad), (pad, pad)],
        dimension_numbers=("NCHW", "OIHW", "NCHW"),
        precision=jax.lax.Precision.HIGHEST)


def ref_forward(x, p):
    t = jax.nn.relu(_ref_bn(x, p["bn1"]))
    y1 = _ref_conv(t, p["w1"], pad=0)
    t2 = jax.nn.relu(_ref_bn(y1, p["bn2"]))
    y2 = _ref_conv(t2, p["w2"], pad=1)
    return jnp.concatenate([x, y2], axis=1)


# ------------------------------- params init ------------------------------- #

def make_params(key, in_channels, growth_rate):
    inner = 4 * growth_rate
    ks = jax.random.split(key, 4)

    def conv_w(k, co, ci, kh, kw):
        fan = ci * kh * kw
        return jax.random.normal(k, (co, ci, kh, kw), jnp.float32) / np.sqrt(fan)

    def bn(k, c):
        k1, k2, k3, k4 = jax.random.split(k, 4)
        gamma = jax.random.uniform(k1, (c,), jnp.float32, 0.5, 1.5)
        beta = jax.random.normal(k2, (c,), jnp.float32) * 0.1
        mean = jax.random.normal(k3, (c,), jnp.float32) * 0.1
        var = jax.random.uniform(k4, (c,), jnp.float32, 0.5, 1.5)
        return (gamma, beta, mean, var)

    return {
        "bn1": bn(ks[0], in_channels),
        "w1": conv_w(ks[1], inner, in_channels, 1, 1),
        "bn2": bn(ks[2], inner),
        "w2": conv_w(ks[3], growth_rate, inner, 3, 3),
    }


# ---------------------------------- main ----------------------------------- #

if __name__ == "__main__":
    key = jax.random.PRNGKey(0)
    kx, kp = jax.random.split(key)

    N, C_IN, H, W = 2, 4, 16, 16
    GROWTH = 8                                  # inner_channels = 32

    x = jax.random.normal(kx, (N, C_IN, H, W), jnp.float32)
    params = make_params(kp, C_IN, GROWTH)

    out = jax.block_until_ready(jax.jit(dense_bottleneck_forward)(x, params))
    ref = jax.block_until_ready(ref_forward(x, params))

    assert out.shape == (N, C_IN + GROWTH, H, W), out.shape
    # bf16 MXU operands with f32 accumulation -> compare against the f32
    # reference with a tolerance that covers bf16 input rounding (~0.4% rel).
    np.testing.assert_allclose(np.asarray(out), np.asarray(ref),
                               rtol=3e-2, atol=3e-2)
    print("KERNEL_OK")
</pallas_src>

<mosaic_0001>
module attributes {stable_mosaic.version = 11 : i64} {
  func.func @_bn_relu_gemm_bn_relu_kernel(%arg0: i32, %arg1: memref<256x4xf32, #tpu.memory_space<vmem>>, %arg2: memref<4x32xbf16, #tpu.memory_space<vmem>>, %arg3: memref<1x4xf32, #tpu.memory_space<vmem>>, %arg4: memref<1x4xf32, #tpu.memory_space<vmem>>, %arg5: memref<1x32xf32, #tpu.memory_space<vmem>>, %arg6: memref<1x32xf32, #tpu.memory_space<vmem>>, %arg7: memref<256x32xf32, #tpu.memory_space<vmem>>) attributes {dimension_semantics = [#tpu.dimension_semantics<parallel>], iteration_bounds = array<i64: 2>, scalar_prefetch = 0 : i64, scratch_operands = 0 : i64, tpu.core_type = #tpu.core_type<tc>, window_params = [{transform_indices = @transform_0, window_bounds = array<i64: 256, 4>}, {pipeline_mode = #tpu.pipeline_mode<synchronous>, transform_indices = @transform_1, window_bounds = array<i64: 4, 32>}, {pipeline_mode = #tpu.pipeline_mode<synchronous>, transform_indices = @transform_2, window_bounds = array<i64: 1, 4>}, {pipeline_mode = #tpu.pipeline_mode<synchronous>, transform_indices = @transform_3, window_bounds = array<i64: 1, 4>}, {pipeline_mode = #tpu.pipeline_mode<synchronous>, transform_indices = @transform_4, window_bounds = array<i64: 1, 32>}, {pipeline_mode = #tpu.pipeline_mode<synchronous>, transform_indices = @transform_5, window_bounds = array<i64: 1, 32>}, {transform_indices = @transform_6, window_bounds = array<i64: 256, 32>}]} {
    %c0 = arith.constant 0 : index
    %c0_0 = arith.constant 0 : index
    %0 = vector.load %arg1[%c0, %c0_0] : memref<256x4xf32, #tpu.memory_space<vmem>>, vector<256x4xf32>
    %c0_1 = arith.constant 0 : index
    %c0_2 = arith.constant 0 : index
    %1 = vector.load %arg3[%c0_1, %c0_2] : memref<1x4xf32, #tpu.memory_space<vmem>>, vector<1x4xf32>
    %2 = vector.broadcast %1 : vector<1x4xf32> to vector<256x4xf32>
    %3 = arith.mulf %0, %2 : vector<256x4xf32>
    %c0_3 = arith.constant 0 : index
    %c0_4 = arith.constant 0 : index
    %4 = vector.load %arg4[%c0_3, %c0_4] : memref<1x4xf32, #tpu.memory_space<vmem>>, vector<1x4xf32>
    %5 = vector.broadcast %4 : vector<1x4xf32> to vector<256x4xf32>
    %6 = arith.addf %3, %5 : vector<256x4xf32>
    %cst = arith.constant 0.000000e+00 : f32
    %7 = vector.broadcast %cst : f32 to vector<256x4xf32>
    %8 = arith.maximumf %6, %7 : vector<256x4xf32>
    %9 = arith.truncf %8 : vector<256x4xf32> to vector<256x4xbf16>
    %c0_5 = arith.constant 0 : index
    %c0_6 = arith.constant 0 : index
    %10 = vector.load %arg2[%c0_5, %c0_6] : memref<4x32xbf16, #tpu.memory_space<vmem>>, vector<4x32xbf16>
    %cst_7 = arith.constant dense<0.000000e+00> : vector<256x32xf32>
    %11 = tpu.matmul %9, %10, %cst_7 {dimension_numbers = #tpu.dot_dimension_numbers<[1], [0], [0], [1], [0, 0, 1, 1], [], []>} : vector<256x4xbf16>, vector<4x32xbf16>, vector<256x32xf32> -> vector<256x32xf32>
    %c0_8 = arith.constant 0 : index
    %c0_9 = arith.constant 0 : index
    %12 = vector.load %arg5[%c0_8, %c0_9] : memref<1x32xf32, #tpu.memory_space<vmem>>, vector<1x32xf32>
    %13 = vector.broadcast %12 : vector<1x32xf32> to vector<256x32xf32>
    %14 = arith.mulf %11, %13 : vector<256x32xf32>
    %c0_10 = arith.constant 0 : index
    %c0_11 = arith.constant 0 : index
    %15 = vector.load %arg6[%c0_10, %c0_11] : memref<1x32xf32, #tpu.memory_space<vmem>>, vector<1x32xf32>
    %16 = vector.broadcast %15 : vector<1x32xf32> to vector<256x32xf32>
    %17 = arith.addf %14, %16 : vector<256x32xf32>
    %cst_12 = arith.constant 0.000000e+00 : f32
    %18 = vector.broadcast %cst_12 : f32 to vector<256x32xf32>
    %19 = arith.maximumf %17, %18 : vector<256x32xf32>
    %c0_13 = arith.constant 0 : index
    %c0_14 = arith.constant 0 : index
    %20 = vector.load %arg7[%c0_13, %c0_14] : memref<256x32xf32, #tpu.memory_space<vmem>>, vector<256x32xf32>
    tpu.vector_store %arg7[%c0_13, %c0_14], %19 {strides = array<i32>} : memref<256x32xf32, #tpu.memory_space<vmem>>, vector<256x32xf32>,
    return
  }
  func.func @transform_0(%arg0: i32) -> (i32, i32) {
    %c0_i32 = arith.constant 0 : i32
    %c0_i32_0 = arith.constant 0 : i32
    return %arg0, %c0_i32 : i32, i32
  }
  func.func @transform_1(%arg0: i32) -> (i32, i32) {
    %c0_i32 = arith.constant 0 : i32
    %c0_i32_0 = arith.constant 0 : i32
    %c0_i32_1 = arith.constant 0 : i32
    return %c0_i32, %c0_i32_0 : i32, i32
  }
  func.func @transform_2(%arg0: i32) -> (i32, i32) {
    %c0_i32 = arith.constant 0 : i32
    %c0_i32_0 = arith.constant 0 : i32
    %c0_i32_1 = arith.constant 0 : i32
    return %c0_i32, %c0_i32_0 : i32, i32
  }
  func.func @transform_3(%arg0: i32) -> (i32, i32) {
    %c0_i32 = arith.constant 0 : i32
    %c0_i32_0 = arith.constant 0 : i32
    %c0_i32_1 = arith.constant 0 : i32
    return %c0_i32, %c0_i32_0 : i32, i32
  }
  func.func @transform_4(%arg0: i32) -> (i32, i32) {
    %c0_i32 = arith.constant 0 : i32
    %c0_i32_0 = arith.constant 0 : i32
    %c0_i32_1 = arith.constant 0 : i32
    return %c0_i32, %c0_i32_0 : i32, i32
  }
  func.func @transform_5(%arg0: i32) -> (i32, i32) {
    %c0_i32 = arith.constant 0 : i32
    %c0_i32_0 = arith.constant 0 : i32
    %c0_i32_1 = arith.constant 0 : i32
    return %c0_i32, %c0_i32_0 : i32, i32
  }
  func.func @transform_6(%arg0: i32) -> (i32, i32) {
    %c0_i32 = arith.constant 0 : i32
    %c0_i32_0 = arith.constant 0 : i32
    return %arg0, %c0_i32 : i32, i32
  }
}

module attributes {stable_mosaic.version = 11 : i64} {
  func.func @_conv3x3_tap_kernel(%arg0: i32, %arg1: memref<1x396x32xf32, #tpu.memory_space<vmem>>, %arg2: memref<9x32x8xbf16, #tpu.memory_space<vmem>>, %arg3: memref<1x324x8xf32, #tpu.memory_space<vmem>>) attributes {dimension_semantics = [#tpu.dimension_semantics<parallel>], iteration_bounds = array<i64: 2>, scalar_prefetch = 0 : i64, scratch_operands = 0 : i64, tpu.core_type = #tpu.core_type<tc>, window_params = [{transform_indices = @transform_0, window_bounds = array<i64: 1, 396, 32>}, {pipeline_mode = #tpu.pipeline_mode<synchronous>, transform_indices = @transform_1, window_bounds = array<i64: 9, 32, 8>}, {transform_indices = @transform_2, window_bounds = array<i64: 1, 324, 8>}]} {
    %cst = arith.constant 0.000000e+00 : f32
    %0 = vector.broadcast %cst : f32 to vector<324x8xf32>
    %c0 = arith.constant 0 : index
    %c17 = arith.constant 17 : index
    %c0_0 = arith.constant 0 : index
    %1 = vector.load %arg1[%c0, %c17, %c0_0] : memref<1x396x32xf32, #tpu.memory_space<vmem>>, vector<1x324x32xf32>
    %2 = vector.shape_cast %1 : vector<1x324x32xf32> to vector<324x32xf32>
    %3 = arith.truncf %2 : vector<324x32xf32> to vector<324x32xbf16>
    %c0_1 = arith.constant 0 : index
    %c0_2 = arith.constant 0 : index
    %c0_3 = arith.constant 0 : index
    %4 = vector.load %arg2[%c0_1, %c0_2, %c0_3] : memref<9x32x8xbf16, #tpu.memory_space<vmem>>, vector<1x32x8xbf16>
    %5 = vector.shape_cast %4 : vector<1x32x8xbf16> to vector<32x8xbf16>
    %cst_4 = arith.constant dense<0.000000e+00> : vector<324x8xf32>
    %6 = tpu.matmul %3, %5, %cst_4 {dimension_numbers = #tpu.dot_dimension_numbers<[1], [0], [0], [1], [0, 0, 1, 1], [], []>} : vector<324x32xbf16>, vector<32x8xbf16>, vector<324x8xf32> -> vector<324x8xf32>
    %7 = arith.addf %0, %6 : vector<324x8xf32>
    %c0_5 = arith.constant 0 : index
    %c18 = arith.constant 18 : index
    %c0_6 = arith.constant 0 : index
    %8 = vector.load %arg1[%c0_5, %c18, %c0_6] : memref<1x396x32xf32, #tpu.memory_space<vmem>>, vector<1x324x32xf32>
    %9 = vector.shape_cast %8 : vector<1x324x32xf32> to vector<324x32xf32>
    %10 = arith.truncf %9 : vector<324x32xf32> to vector<324x32xbf16>
    %c1 = arith.constant 1 : index
    %c0_7 = arith.constant 0 : index
    %c0_8 = arith.constant 0 : index
    %11 = vector.load %arg2[%c1, %c0_7, %c0_8] : memref<9x32x8xbf16, #tpu.memory_space<vmem>>, vector<1x32x8xbf16>
    %12 = vector.shape_cast %11 : vector<1x32x8xbf16> to vector<32x8xbf16>
    %cst_9 = arith.constant dense<0.000000e+00> : vector<324x8xf32>
    %13 = tpu.matmul %10, %12, %cst_9 {dimension_numbers = #tpu.dot_dimension_numbers<[1], [0], [0], [1], [0, 0, 1, 1], [], []>} : vector<324x32xbf16>, vector<32x8xbf16>, vector<324x8xf32> -> vector<324x8xf32>
    %14 = arith.addf %7, %13 : vector<324x8xf32>
    %c0_10 = arith.constant 0 : index
    %c19 = arith.constant 19 : index
    %c0_11 = arith.constant 0 : index
    %15 = vector.load %arg1[%c0_10, %c19, %c0_11] : memref<1x396x32xf32, #tpu.memory_space<vmem>>, vector<1x324x32xf32>
    %16 = vector.shape_cast %15 : vector<1x324x32xf32> to vector<324x32xf32>
    %17 = arith.truncf %16 : vector<324x32xf32> to vector<324x32xbf16>
    %c2 = arith.constant 2 : index
    %c0_12 = arith.constant 0 : index
    %c0_13 = arith.constant 0 : index
    %18 = vector.load %arg2[%c2, %c0_12, %c0_13] : memref<9x32x8xbf16, #tpu.memory_space<vmem>>, vector<1x32x8xbf16>
    %19 = vector.shape_cast %18 : vector<1x32x8xbf16> to vector<32x8xbf16>
    %cst_14 = arith.constant dense<0.000000e+00> : vector<324x8xf32>
    %20 = tpu.matmul %17, %19, %cst_14 {dimension_numbers = #tpu.dot_dimension_numbers<[1], [0], [0], [1], [0, 0, 1, 1], [], []>} : vector<324x32xbf16>, vector<32x8xbf16>, vector<324x8xf32> -> vector<324x8xf32>
    %21 = arith.addf %14, %20 : vector<324x8xf32>
    %c0_15 = arith.constant 0 : index
    %c35 = arith.constant 35 : index
    %c0_16 = arith.constant 0 : index
    %22 = vector.load %arg1[%c0_15, %c35, %c0_16] : memref<1x396x32xf32, #tpu.memory_space<vmem>>, vector<1x324x32xf32>
    %23 = vector.shape_cast %22 : vector<1x324x32xf32> to vector<324x32xf32>
    %24 = arith.truncf %23 : vector<324x32xf32> to vector<324x32xbf16>
    %c3 = arith.constant 3 : index
    %c0_17 = arith.constant 0 : index
    %c0_18 = arith.constant 0 : index
    %25 = vector.load %arg2[%c3, %c0_17, %c0_18] : memref<9x32x8xbf16, #tpu.memory_space<vmem>>, vector<1x32x8xbf16>
    %26 = vector.shape_cast %25 : vector<1x32x8xbf16> to vector<32x8xbf16>
    %cst_19 = arith.constant dense<0.000000e+00> : vector<324x8xf32>
    %27 = tpu.matmul %24, %26, %cst_19 {dimension_numbers = #tpu.dot_dimension_numbers<[1], [0], [0], [1], [0, 0, 1, 1], [], []>} : vector<324x32xbf16>, vector<32x8xbf16>, vector<324x8xf32> -> vector<324x8xf32>
    %28 = arith.addf %21, %27 : vector<324x8xf32>
    %c0_20 = arith.constant 0 : index
    %c36 = arith.constant 36 : index
    %c0_21 = arith.constant 0 : index
    %29 = vector.load %arg1[%c0_20, %c36, %c0_21] : memref<1x396x32xf32, #tpu.memory_space<vmem>>, vector<1x324x32xf32>
    %30 = vector.shape_cast %29 : vector<1x324x32xf32> to vector<324x32xf32>
    %31 = arith.truncf %30 : vector<324x32xf32> to vector<324x32xbf16>
    %c4 = arith.constant 4 : index
    %c0_22 = arith.constant 0 : index
    %c0_23 = arith.constant 0 : index
    %32 = vector.load %arg2[%c4, %c0_22, %c0_23] : memref<9x32x8xbf16, #tpu.memory_space<vmem>>, vector<1x32x8xbf16>
    %33 = vector.shape_cast %32 : vector<1x32x8xbf16> to vector<32x8xbf16>
    %cst_24 = arith.constant dense<0.000000e+00> : vector<324x8xf32>
    %34 = tpu.matmul %31, %33, %cst_24 {dimension_numbers = #tpu.dot_dimension_numbers<[1], [0], [0], [1], [0, 0, 1, 1], [], []>} : vector<324x32xbf16>, vector<32x8xbf16>, vector<324x8xf32> -> vector<324x8xf32>
    %35 = arith.addf %28, %34 : vector<324x8xf32>
    %c0_25 = arith.constant 0 : index
    %c37 = arith.constant 37 : index
    %c0_26 = arith.constant 0 : index
    %36 = vector.load %arg1[%c0_25, %c37, %c0_26] : memref<1x396x32xf32, #tpu.memory_space<vmem>>, vector<1x324x32xf32>
    %37 = vector.shape_cast %36 : vector<1x324x32xf32> to vector<324x32xf32>
    %38 = arith.truncf %37 : vector<324x32xf32> to vector<324x32xbf16>
    %c5 = arith.constant 5 : index
    %c0_27 = arith.constant 0 : index
    %c0_28 = arith.constant 0 : index
    %39 = vector.load %arg2[%c5, %c0_27, %c0_28] : memref<9x32x8xbf16, #tpu.memory_space<vmem>>, vector<1x32x8xbf16>
    %40 = vector.shape_cast %39 : vector<1x32x8xbf16> to vector<32x8xbf16>
    %cst_29 = arith.constant dense<0.000000e+00> : vector<324x8xf32>
    %41 = tpu.matmul %38, %40, %cst_29 {dimension_numbers = #tpu.dot_dimension_numbers<[1], [0], [0], [1], [0, 0, 1, 1], [], []>} : vector<324x32xbf16>, vector<32x8xbf16>, vector<324x8xf32> -> vector<324x8xf32>
    %42 = arith.addf %35, %41 : vector<324x8xf32>
    %c0_30 = arith.constant 0 : index
    %c53 = arith.constant 53 : index
    %c0_31 = arith.constant 0 : index
    %43 = vector.load %arg1[%c0_30, %c53, %c0_31] : memref<1x396x32xf32, #tpu.memory_space<vmem>>, vector<1x324x32xf32>
    %44 = vector.shape_cast %43 : vector<1x324x32xf32> to vector<324x32xf32>
    %45 = arith.truncf %44 : vector<324x32xf32> to vector<324x32xbf16>
    %c6 = arith.constant 6 : index
    %c0_32 = arith.constant 0 : index
    %c0_33 = arith.constant 0 : index
    %46 = vector.load %arg2[%c6, %c0_32, %c0_33] : memref<9x32x8xbf16, #tpu.memory_space<vmem>>, vector<1x32x8xbf16>
    %47 = vector.shape_cast %46 : vector<1x32x8xbf16> to vector<32x8xbf16>
    %cst_34 = arith.constant dense<0.000000e+00> : vector<324x8xf32>
    %48 = tpu.matmul %45, %47, %cst_34 {dimension_numbers = #tpu.dot_dimension_numbers<[1], [0], [0], [1], [0, 0, 1, 1], [], []>} : vector<324x32xbf16>, vector<32x8xbf16>, vector<324x8xf32> -> vector<324x8xf32>
    %49 = arith.addf %42, %48 : vector<324x8xf32>
    %c0_35 = arith.constant 0 : index
    %c54 = arith.constant 54 : index
    %c0_36 = arith.constant 0 : index
    %50 = vector.load %arg1[%c0_35, %c54, %c0_36] : memref<1x396x32xf32, #tpu.memory_space<vmem>>, vector<1x324x32xf32>
    %51 = vector.shape_cast %50 : vector<1x324x32xf32> to vector<324x32xf32>
    %52 = arith.truncf %51 : vector<324x32xf32> to vector<324x32xbf16>
    %c7 = arith.constant 7 : index
    %c0_37 = arith.constant 0 : index
    %c0_38 = arith.constant 0 : index
    %53 = vector.load %arg2[%c7, %c0_37, %c0_38] : memref<9x32x8xbf16, #tpu.memory_space<vmem>>, vector<1x32x8xbf16>
    %54 = vector.shape_cast %53 : vector<1x32x8xbf16> to vector<32x8xbf16>
    %cst_39 = arith.constant dense<0.000000e+00> : vector<324x8xf32>
    %55 = tpu.matmul %52, %54, %cst_39 {dimension_numbers = #tpu.dot_dimension_numbers<[1], [0], [0], [1], [0, 0, 1, 1], [], []>} : vector<324x32xbf16>, vector<32x8xbf16>, vector<324x8xf32> -> vector<324x8xf32>
    %56 = arith.addf %49, %55 : vector<324x8xf32>
    %c0_40 = arith.constant 0 : index
    %c55 = arith.constant 55 : index
    %c0_41 = arith.constant 0 : index
    %57 = vector.load %arg1[%c0_40, %c55, %c0_41] : memref<1x396x32xf32, #tpu.memory_space<vmem>>, vector<1x324x32xf32>
    %58 = vector.shape_cast %57 : vector<1x324x32xf32> to vector<324x32xf32>
    %59 = arith.truncf %58 : vector<324x32xf32> to vector<324x32xbf16>
    %c8 = arith.constant 8 : index
    %c0_42 = arith.constant 0 : index
    %c0_43 = arith.constant 0 : index
    %60 = vector.load %arg2[%c8, %c0_42, %c0_43] : memref<9x32x8xbf16, #tpu.memory_space<vmem>>, vector<1x32x8xbf16>
    %61 = vector.shape_cast %60 : vector<1x32x8xbf16> to vector<32x8xbf16>
    %cst_44 = arith.constant dense<0.000000e+00> : vector<324x8xf32>
    %62 = tpu.matmul %59, %61, %cst_44 {dimension_numbers = #tpu.dot_dimension_numbers<[1], [0], [0], [1], [0, 0, 1, 1], [], []>} : vector<324x32xbf16>, vector<32x8xbf16>, vector<324x8xf32> -> vector<324x8xf32>
    %63 = arith.addf %56, %62 : vector<324x8xf32>
    %c0_45 = arith.constant 0 : index
    %c0_46 = arith.constant 0 : index
    %c0_47 = arith.constant 0 : index
    %64 = vector.load %arg3[%c0_45, %c0_46, %c0_47] : memref<1x324x8xf32, #tpu.memory_space<vmem>>, vector<1x324x8xf32>
    %65 = vector.shape_cast %64 : vector<1x324x8xf32> to vector<324x8xf32>
    %66 = vector.shape_cast %63 : vector<324x8xf32> to vector<1x324x8xf32>
    tpu.vector_store %arg3[%c0_45, %c0_46, %c0_47], %66 {strides = array<i32>} : memref<1x324x8xf32, #tpu.memory_space<vmem>>, vector<1x324x8xf32>,
    return
  }
  func.func @transform_0(%arg0: i32) -> (i32, i32, i32) {
    %c0_i32 = arith.constant 0 : i32
    %c0_i32_0 = arith.constant 0 : i32
    %c0_i32_1 = arith.constant 0 : i32
    return %arg0, %c0_i32, %c0_i32_0 : i32, i32, i32
  }
  func.func @transform_1(%arg0: i32) -> (i32, i32, i32) {
    %c0_i32 = arith.constant 0 : i32
    %c0_i32_0 = arith.constant 0 : i32
    %c0_i32_1 = arith.constant 0 : i32
    %c0_i32_2 = arith.constant 0 : i32
    return %c0_i32, %c0_i32_0, %c0_i32_1 : i32, i32, i32
  }
  func.func @transform_2(%arg0: i32) -> (i32, i32, i32) {
    %c0_i32 = arith.constant 0 : i32
    %c0_i32_0 = arith.constant 0 : i32
    %c0_i32_1 = arith.constant 0 : i32
    return %arg0, %c0_i32, %c0_i32_0 : i32, i32, i32
  }
}

</mosaic_0001>

<bundles_post_ra>
// kernel: dense_bottleneck_forward.2
= control target key start
LH: loop header
LB: loop body
LE: loop exit
PB: predicated region body
PF: predicated region fallthrough
CT: control target
= control target key end

     0   :  { %s965_s21 = smov 0   ;;  %s1256_s0 = inlined_call_operand.vmem [shape: f32[512,4], index: 0, kind: input, shape index: {}]   ;;  %s1257_s1 = inlined_call_operand.vmem [shape: bf16[4,32], index: 1, kind: input, shape index: {}]   ;;  %s1258_s2 = inlined_call_operand.vmem [shape: f32[1,4], index: 2, kind: input, shape index: {}]   ;;  %s1259_s3 = inlined_call_operand.vmem [shape: f32[1,4], index: 3, kind: input, shape index: {}]   ;;  %s1260_s4 = inlined_call_operand.vmem [shape: f32[1,32], index: 4, kind: input, shape index: {}]   ;;  %s1261_s5 = inlined_call_operand.vmem [shape: f32[1,32], index: 5, kind: input, shape index: {}]   ;;  %s1262_s6 = inlined_call_operand.vmem [shape: f32[512,32], index: 6, kind: output, shape index: {}]  }
   0x1 LB: > { %s828_s22 = sadd.s32 4294967295, %s928_s21   ;;  %p832_p0 = scmp.ge.s32.totalorder %s928_s21, 1  ;;  %s928_s21 = sphi %s965_s21, %s16_s21  }
   0x2   : > { %p213_p1 = scmp.lt.s32.totalorder %s928_s21, 3 }
   0x4   : > { %p214_p2 = pnand %p832_p0, %p213_p1 }
   0x5   : > { %v414_v0 = vld [vmem:[%s1257_s1] sm:$0x3] (!%p214_p2)  ;;  %vm464_vm0 = vcmask (!%p214_p2), 1041408   ;;  %s833_s25 = sshll.u32 (!%p214_p2), %s828_s22, 5  ;;  %vm415_vm1 = vcmask (!%p214_p2), 31744   ;;  %vm739_vm2 = vcmask (!%p214_p2), 261120  }
   0x6   : > { %217 = sbr.rel (%p214_p2) target bundleno = 274 (0x112), region = 44  ;;  %912 = vmatprep.subr.msk.bf16.mxu0 (!%p214_p2), %vm464_vm0, %v414_v0  ;;  %913 = vmatprep.subr.msk.bf16.mxu1 (!%p214_p2), %vm464_vm0, %v414_v0  ;;  %v466_v1 = vsel (!%p214_p2), %vm464_vm0, %v414_v0, 0  ;;  %p244_p3 = scmp.lt.s32.totalorder (!%p214_p2), %s833_s25, 63  ;;  %v982_v2 = vld [vmem:[%s1258_s2] ss:$0 sm:$0xff] (!%p214_p2) }
   0x7   : > { %877 = vmatpush3.bf16.msra.mxu0 (!%p214_p2), %v466_v1  ;;  %911 = vmatpush3.bf16.msra.mxu1 (!%p214_p2), %v466_v1  ;;  %v994_v3 = vld [vmem:[%s1259_s3] ss:$0 sm:$0xff] (!%p214_p2) }
   0xd   : > { %s1264_s25 = smov (!%p244_p3, %s833_s25), 63 }
   0xe   : > { %s834_s26 = sshll.u32 %s1264_s25, 3 }
   0xf   : > { %s989_s7 = scalar_lea.vmem %s1256_s0, %s834_s26  ;;  %s1128_s16 = scalar_lea.vmem %s1262_s6, %s834_s26 }
  0x10   : > { %v256_v4 = vld [vmem:[%s989_s7] sm:$0xff]  ;;  %v257_v5 = vld [vmem:[%s989_s7 + $0x8] sm:$0xff]  ;;  %v258_v11 = vld [vmem:[%s989_s7 + $0x10] sm:$0xff] }
  0x11   : > { %v272_v6 = vld [vmem:[%s989_s7 + $0x80] sm:$0xff]  ;;  %v295_v7 = vmul.f32 %v982_v2, %v256_v4  ;;  %v296_v8 = vmul.f32 %v982_v2, %v257_v5  ;;  %v273_v9 = vld [vmem:[%s989_s7 + $0x88] sm:$0xff]  ;;  %v259_v12 = vld [vmem:[%s989_s7 + $0x18] sm:$0xff]  ;;  %v297_v14 = vmul.f32 %v982_v2, %v258_v11 }
  0x12   : > { %v311_v10 = vmul.f32 %v982_v2, %v272_v6  ;;  %v312_v13 = vmul.f32 %v982_v2, %v273_v9  ;;  %v298_v15 = vmul.f32 %v982_v2, %v259_v12  ;;  %v274_v16 = vld [vmem:[%s989_s7 + $0x90] sm:$0xff]  ;;  %v275_v17 = vld [vmem:[%s989_s7 + $0x98] sm:$0xff]  ;;  %v260_v26 = vld [vmem:[%s989_s7 + $0x20] sm:$0xff] }
  0x13   : > { %v334_v18 = vadd.f32 %v994_v3, %v295_v7  ;;  %v335_v19 = vadd.f32 %v994_v3, %v296_v8  ;;  %v313_v21 = vmul.f32 %v982_v2, %v274_v16  ;;  %v336_v23 = vadd.f32 %v994_v3, %v297_v14  ;;  %v261_v27 = vld [vmem:[%s989_s7 + $0x28] sm:$0xff]  ;;  %v276_v32 = vld [vmem:[%s989_s7 + $0xa0] sm:$0xff]  ;;  %v262_v38 = vld [vmem:[%s989_s7 + $0x30] sm:$0xff] }
  0x14   : > { %v350_v20 = vadd.f32 %v994_v3, %v311_v10  ;;  %v351_v22 = vadd.f32 %v994_v3, %v312_v13  ;;  %v337_v24 = vadd.f32 %v994_v3, %v298_v15  ;;  %v314_v25 = vmul.f32 %v982_v2, %v275_v17  ;;  %v277_v37 = vld [vmem:[%s989_s7 + $0xa8] sm:$0xff]  ;;  %v263_v43 = vld [vmem:[%s989_s7 + $0x38] sm:$0xff]  ;;  %v278_v52 = vld [vmem:[%s989_s7 + $0xb0] sm:$0xff] }
  0x15   : > { %v366_v28 = vmax.f32 %v334_v18, 0.0  ;;  %v367_v29 = vmax.f32 %v335_v19, 0.0  ;;  %v352_v31 = vadd.f32 %v994_v3, %v313_v21  ;;  %v368_v34 = vmax.f32 %v336_v23, 0.0  ;;  %v279_v53 = vld [vmem:[%s989_s7 + $0xb8] sm:$0xff]  ;;  %v264_v57 = vld [vmem:[%s989_s7 + $0x40] sm:$0xff]  ;;  %v265_v62 = vld [vmem:[%s989_s7 + $0x48] sm:$0xff] }
  0x16   : > { %v382_v30 = vmax.f32 %v350_v20, 0.0  ;;  %v383_v33 = vmax.f32 %v351_v22, 0.0  ;;  %v369_v35 = vmax.f32 %v337_v24, 0.0  ;;  %v353_v36 = vadd.f32 %v994_v3, %v314_v25  ;;  %v280_v5 = vld [vmem:[%s989_s7 + $0xc0] sm:$0xff]  ;;  %v281_v6 = vld [vmem:[%s989_s7 + $0xc8] sm:$0xff]  ;;  %v266_v15 = vld [vmem:[%s989_s7 + $0x50] sm:$0xff] }
  0x17   : > { %v398_v39 = vpack.c.bf16 %v367_v29, %v366_v28  ;;  %v384_v40 = vmax.f32 %v352_v31, 0.0  ;;  %v299_v41 = vmul.f32 %v982_v2, %v260_v26  ;;  %v300_v42 = vmul.f32 %v982_v2, %v261_v27  ;;  %v267_v20 = vld [vmem:[%s989_s7 + $0x58] sm:$0xff]  ;;  %v282_v21 = vld [vmem:[%s989_s7 + $0xd0] sm:$0xff]  ;;  %v268_v31 = vld [vmem:[%s989_s7 + $0x60] sm:$0xff] }
  0x18   : > { %v406_v44 = vpack.c.bf16 %v383_v33, %v382_v30  ;;  %v399_v45 = vpack.c.bf16 %v369_v35, %v368_v34  ;;  %v385_v46 = vmax.f32 %v353_v36, 0.0  ;;  %v315_v47 = vmul.f32 %v982_v2, %v276_v32  ;;  %v283_v26 = vld [vmem:[%s989_s7 + $0xd8] sm:$0xff]  ;;  %v269_v36 = vld [vmem:[%s989_s7 + $0x68] sm:$0xff] }
  0x19   : > { %878 = vmatprep.mubr.msk.bf16.mxu0 %vm415_vm1, %v398_v39  ;;  %v338_v48 = vadd.f32 %v994_v3, %v299_v41  ;;  %v339_v49 = vadd.f32 %v994_v3, %v300_v42  ;;  %v316_v50 = vmul.f32 %v982_v2, %v277_v37  ;;  %v301_v51 = vmul.f32 %v982_v2, %v262_v38  ;;  %v284_v41 = vld [vmem:[%s989_s7 + $0xe0] sm:$0xff] }
  0x1a   : > { %894 = vmatprep.mubr.msk.bf16.mxu1 %vm415_vm1, %v406_v44  ;;  %879 = vmatmul.mubr.msk.bf16.vlgmr.msra.gmra.mrb[0].mxu0 %vm415_vm1, %v399_v45  ;;  %v407_v54 = vpack.c.bf16 %v385_v46, %v384_v40  ;;  %v354_v55 = vadd.f32 %v994_v3, %v315_v47  ;;  %v302_v56 = vmul.f32 %v982_v2, %v263_v43  ;;  %v285_v46 = vld [vmem:[%s989_s7 + $0xe8] sm:$0xff]  ;;  %v270_v47 = vld [vmem:[%s989_s7 + $0x70] sm:$0xff] }
  0x1b   : > { %v370_v58 = vmax.f32 %v338_v48, 0.0  ;;  %v371_v59 = vmax.f32 %v339_v49, 0.0  ;;  %v355_v60 = vadd.f32 %v994_v3, %v316_v50  ;;  %v340_v61 = vadd.f32 %v994_v3, %v301_v51 }
  0x1c   : > { %895 = vmatmul.mubr.msk.bf16.vlgmr.msra.gmra.mrb[0].mxu1 %vm415_vm1, %v407_v54  ;;  %v386_v63 = vmax.f32 %v354_v55, 0.0  ;;  %v341_v0 = vadd.f32 %v994_v3, %v302_v56  ;;  %v317_v1 = vmul.f32 %v982_v2, %v278_v52  ;;  %v318_v4 = vmul.f32 %v982_v2, %v279_v53  ;;  %v271_v52 = vld [vmem:[%s989_s7 + $0x78] sm:$0xff] }
  0x1d   : > { %v400_v7 = vpack.c.bf16 %v371_v59, %v370_v58  ;;  %v387_v8 = vmax.f32 %v355_v60, 0.0  ;;  %v372_v9 = vmax.f32 %v340_v61, 0.0  ;;  %v303_v10 = vmul.f32 %v982_v2, %v264_v57  ;;  %v286_v61 = vld [vmem:[%s989_s7 + $0xf0] sm:$0xff] }
  0x1e   : > { %v373_v11 = vmax.f32 %v341_v0, 0.0  ;;  %v356_v12 = vadd.f32 %v994_v3, %v317_v1  ;;  %v357_v13 = vadd.f32 %v994_v3, %v318_v4  ;;  %v304_v14 = vmul.f32 %v982_v2, %v265_v62  ;;  %v287_v62 = vld [vmem:[%s989_s7 + $0xf8] sm:$0xff] }
  0x1f   : > { %882 = vmatprep.mubr.msk.bf16.mxu0 %vm415_vm1, %v400_v7  ;;  %v408_v16 = vpack.c.bf16 %v387_v8, %v386_v63  ;;  %v342_v17 = vadd.f32 %v994_v3, %v303_v10  ;;  %v319_v18 = vmul.f32 %v982_v2, %v280_v5  ;;  %v320_v19 = vmul.f32 %v982_v2, %v281_v6 }
  0x20   : > { %v401_v22 = vpack.c.bf16 %v373_v11, %v372_v9  ;;  %v388_v23 = vmax.f32 %v356_v12, 0.0  ;;  %v389_v24 = vmax.f32 %v357_v13, 0.0  ;;  %v343_v25 = vadd.f32 %v994_v3, %v304_v14 }
  0x21   : > { %898 = vmatprep.mubr.msk.bf16.mxu1 %vm415_vm1, %v408_v16  ;;  %v374_v27 = vmax.f32 %v342_v17, 0.0  ;;  %v358_v28 = vadd.f32 %v994_v3, %v319_v18  ;;  %v359_v29 = vadd.f32 %v994_v3, %v320_v19  ;;  %v305_v30 = vmul.f32 %v982_v2, %v266_v15 }
  0x22   : > { %883 = vmatmul.mubr.msk.bf16.gmra.mrb[4].mxu0 %vm415_vm1, %v401_v22  ;;  %v409_v32 = vpack.c.bf16 %v389_v24, %v388_v23  ;;  %v375_v33 = vmax.f32 %v343_v25, 0.0  ;;  %v306_v34 = vmul.f32 %v982_v2, %v267_v20  ;;  %v321_v35 = vmul.f32 %v982_v2, %v282_v21  ;;  %v1116_v24 = vld [vmem:[%s1261_s5] ss:$0 sm:$0xff] }
  0x23   : > { %v390_v37 = vmax.f32 %v358_v28, 0.0  ;;  %v391_v38 = vmax.f32 %v359_v29, 0.0  ;;  %v344_v39 = vadd.f32 %v994_v3, %v305_v30  ;;  %v322_v40 = vmul.f32 %v982_v2, %v283_v26 }
  0x24   : > { %899 = vmatmul.mubr.msk.bf16.gmra.mrb[4].mxu1 %vm415_vm1, %v409_v32  ;;  %v402_v42 = vpack.c.bf16 %v375_v33, %v374_v27  ;;  %v345_v43 = vadd.f32 %v994_v3, %v306_v34  ;;  %v360_v44 = vadd.f32 %v994_v3, %v321_v35  ;;  %v307_v45 = vmul.f32 %v982_v2, %v268_v31 }
  0x25   : > { %v410_v48 = vpack.c.bf16 %v391_v38, %v390_v37  ;;  %v376_v49 = vmax.f32 %v344_v39, 0.0  ;;  %v361_v50 = vadd.f32 %v994_v3, %v322_v40  ;;  %v308_v51 = vmul.f32 %v982_v2, %v269_v36 }
  0x26   : > { %886 = vmatprep.mubr.msk.bf16.mxu0 %vm415_vm1, %v402_v42  ;;  %v377_v53 = vmax.f32 %v345_v43, 0.0  ;;  %v392_v54 = vmax.f32 %v360_v44, 0.0  ;;  %v346_v55 = vadd.f32 %v994_v3, %v307_v45  ;;  %v323_v56 = vmul.f32 %v982_v2, %v284_v41 }
  0x27   : > { %902 = vmatprep.mubr.msk.bf16.mxu1 %vm415_vm1, %v410_v48  ;;  %v393_v57 = vmax.f32 %v361_v50, 0.0  ;;  %v347_v58 = vadd.f32 %v994_v3, %v308_v51  ;;  %v324_v59 = vmul.f32 %v982_v2, %v285_v46  ;;  %v309_v60 = vmul.f32 %v982_v2, %v270_v47 }
  0x28   : > { %v403_v63 = vpack.c.bf16 %v377_v53, %v376_v49  ;;  %v378_v0 = vmax.f32 %v346_v55, 0.0  ;;  %v362_v1 = vadd.f32 %v994_v3, %v323_v56  ;;  %v310_v4 = vmul.f32 %v982_v2, %v271_v52 }
  0x29   : > { %v411_v5 = vpack.c.bf16 %v393_v57, %v392_v54  ;;  %v379_v6 = vmax.f32 %v347_v58, 0.0  ;;  %v363_v7 = vadd.f32 %v994_v3, %v324_v59  ;;  %v348_v8 = vadd.f32 %v994_v3, %v309_v60 }
  0x2a   : > { %887 = vmatmul.mubr.msk.bf16.gmra.mrb[8].mxu0 %vm415_vm1, %v403_v63  ;;  %v394_v9 = vmax.f32 %v362_v1, 0.0  ;;  %v349_v10 = vadd.f32 %v994_v3, %v310_v4  ;;  %v325_v11 = vmul.f32 %v982_v2, %v286_v61  ;;  %v326_v12 = vmul.f32 %v982_v2, %v287_v62  ;;  %v1111_v2 = vld [vmem:[%s1260_s4] ss:$0 sm:$0xff] }
  0x2b   : > { %v404_v13 = vpack.c.bf16 %v379_v6, %v378_v0  ;;  %v395_v14 = vmax.f32 %v363_v7, 0.0  ;;  %v380_v15 = vmax.f32 %v348_v8, 0.0 }
  0x2c   : > { %903 = vmatmul.mubr.msk.bf16.gmra.mrb[8].mxu1 %vm415_vm1, %v411_v5  ;;  %v381_v16 = vmax.f32 %v349_v10, 0.0  ;;  %v364_v17 = vadd.f32 %v994_v3, %v325_v11  ;;  %v365_v18 = vadd.f32 %v994_v3, %v326_v12 }
  0x2d   : > { %890 = vmatprep.mubr.msk.bf16.mxu0 %vm415_vm1, %v404_v13  ;;  %v412_v19 = vpack.c.bf16 %v395_v14, %v394_v9 }
  0x2e   : > { %v405_v20 = vpack.c.bf16 %v381_v16, %v380_v15  ;;  %v396_v21 = vmax.f32 %v364_v17, 0.0  ;;  %v397_v22 = vmax.f32 %v365_v18, 0.0 }
  0x2f   : > { %906 = vmatprep.mubr.msk.bf16.mxu1 %vm415_vm1, %v412_v19 }
  0x30   : > { %v413_v23 = vpack.c.bf16 %v397_v22, %v396_v21 }
  0x32   : > { %891 = vmatmul.mubr.msk.bf16.gmra.mrb[12].mxu0 %vm415_vm1, %v405_v20 }
  0x34   : > { %907 = vmatmul.mubr.msk.bf16.gmra.mrb[12].mxu1 %vm415_vm1, %v413_v23 }
  0xed   : > { %v880_v3 = vpop.f32.mrb[0].mxu0 }
  0xee   : > { %v638_v25 = vmul.f32 %v880_v3, %v1111_v2  ;;  %v502_v26 = vpop.f32.mrb[1].mxu0 }
  0xef   : > { %v896_v27 = vpop.f32.mrb[0].mxu1  ;;  %v636_v28 = vmul.f32 %v1111_v2, %v502_v26  ;;  %v881_v29 = vpop.f32.mrb[2].mxu0 }
  0xf0   : > { %v677_v30 = vadd.f32 %v1116_v24, %v638_v25  ;;  %v654_v31 = vmul.f32 %v896_v27, %v1111_v2  ;;  %v566_v32 = vpop.f32.mrb[1].mxu1  ;;  %v639_v33 = vmul.f32 %v881_v29, %v1111_v2  ;;  %v505_v34 = vpop.f32.mrb[3].mxu0 }
  0xf1   : > { %v675_v35 = vadd.f32 %v1116_v24, %v636_v28  ;;  %v652_v36 = vmul.f32 %v1111_v2, %v566_v32  ;;  %v897_v37 = vpop.f32.mrb[2].mxu1  ;;  %v637_v38 = vmul.f32 %v1111_v2, %v505_v34 }
  0xf2   : > { %v709_v39 = vmax.f32 %v677_v30, 0.0  ;;  %v693_v40 = vadd.f32 %v1116_v24, %v654_v31  ;;  %v678_v41 = vadd.f32 %v1116_v24, %v639_v33  ;;  %v655_v42 = vmul.f32 %v897_v37, %v1111_v2  ;;  %v569_v43 = vpop.f32.mrb[3].mxu1 }
  0xf3   : > { %v707_v44 = vmax.f32 %v675_v35, 0.0  ;;  %v691_v45 = vadd.f32 %v1116_v24, %v652_v36  ;;  %v676_v46 = vadd.f32 %v1116_v24, %v637_v38  ;;  %v653_v47 = vmul.f32 %v1111_v2, %v569_v43 }
  0xf4   : > { %742 = vst.msk [vmem:[%s1128_s16 + $0x10] sm:$0xff] %vm739_vm2, %v709_v39  ;;  %v725_v48 = vmax.f32 %v693_v40, 0.0  ;;  %v710_v49 = vmax.f32 %v678_v41, 0.0  ;;  %v694_v50 = vadd.f32 %v1116_v24, %v655_v42 }
  0xf5   : > { %740 = vst.msk [vmem:[%s1128_s16] sm:$0xff] %vm739_vm2, %v707_v44  ;;  %v723_v51 = vmax.f32 %v691_v45, 0.0  ;;  %v708_v52 = vmax.f32 %v676_v46, 0.0  ;;  %v692_v53 = vadd.f32 %v1116_v24, %v653_v47  ;;  %v884_v54 = vpop.f32.mrb[4].mxu0 }
  0xf6   : > { %758 = vst.msk [vmem:[%s1128_s16 + $0x90] sm:$0xff] %vm739_vm2, %v725_v48  ;;  %743 = vst.msk [vmem:[%s1128_s16 + $0x18] sm:$0xff] %vm739_vm2, %v710_v49  ;;  %v726_v55 = vmax.f32 %v694_v50, 0.0  ;;  %v642_v56 = vmul.f32 %v884_v54, %v1111_v2  ;;  %v518_v57 = vpop.f32.mrb[5].mxu0 }
  0xf7   : > { %756 = vst.msk [vmem:[%s1128_s16 + $0x80] sm:$0xff] %vm739_vm2, %v723_v51  ;;  %741 = vst.msk [vmem:[%s1128_s16 + $0x8] sm:$0xff] %vm739_vm2, %v708_v52  ;;  %v724_v58 = vmax.f32 %v692_v53, 0.0  ;;  %v900_v59 = vpop.f32.mrb[4].mxu1  ;;  %v640_v60 = vmul.f32 %v1111_v2, %v518_v57  ;;  %v885_v61 = vpop.f32.mrb[6].mxu0 }
  0xf8   : > { %759 = vst.msk [vmem:[%s1128_s16 + $0x98] sm:$0xff] %vm739_vm2, %v726_v55  ;;  %v681_v62 = vadd.f32 %v1116_v24, %v642_v56  ;;  %v658_v63 = vmul.f32 %v900_v59, %v1111_v2  ;;  %v582_v0 = vpop.f32.mrb[5].mxu1  ;;  %v643_v1 = vmul.f32 %v885_v61, %v1111_v2  ;;  %v521_v4 = vpop.f32.mrb[7].mxu0 }
  0xf9   : > { %757 = vst.msk [vmem:[%s1128_s16 + $0x88] sm:$0xff] %vm739_vm2, %v724_v58  ;;  %v679_v5 = vadd.f32 %v1116_v24, %v640_v60  ;;  %v656_v6 = vmul.f32 %v1111_v2, %v582_v0  ;;  %v901_v7 = vpop.f32.mrb[6].mxu1  ;;  %v641_v8 = vmul.f32 %v1111_v2, %v521_v4 }
  0xfa   : > { %v713_v9 = vmax.f32 %v681_v62, 0.0  ;;  %v697_v10 = vadd.f32 %v1116_v24, %v658_v63  ;;  %v682_v11 = vadd.f32 %v1116_v24, %v643_v1  ;;  %v659_v12 = vmul.f32 %v901_v7, %v1111_v2  ;;  %v585_v13 = vpop.f32.mrb[7].mxu1 }
  0xfb   : > { %v711_v14 = vmax.f32 %v679_v5, 0.0  ;;  %v695_v15 = vadd.f32 %v1116_v24, %v656_v6  ;;  %v680_v16 = vadd.f32 %v1116_v24, %v641_v8  ;;  %v657_v17 = vmul.f32 %v1111_v2, %v585_v13 }
  0xfc   : > { %746 = vst.msk [vmem:[%s1128_s16 + $0x30] sm:$0xff] %vm739_vm2, %v713_v9  ;;  %v729_v18 = vmax.f32 %v697_v10, 0.0  ;;  %v714_v19 = vmax.f32 %v682_v11, 0.0  ;;  %v698_v20 = vadd.f32 %v1116_v24, %v659_v12 }
  0xfd   : > { %744 = vst.msk [vmem:[%s1128_s16 + $0x20] sm:$0xff] %vm739_vm2, %v711_v14  ;;  %v727_v21 = vmax.f32 %v695_v15, 0.0  ;;  %v712_v22 = vmax.f32 %v680_v16, 0.0  ;;  %v696_v23 = vadd.f32 %v1116_v24, %v657_v17  ;;  %v888_v3 = vpop.f32.mrb[8].mxu0 }
  0xfe   : > { %762 = vst.msk [vmem:[%s1128_s16 + $0xb0] sm:$0xff] %vm739_vm2, %v729_v18  ;;  %747 = vst.msk [vmem:[%s1128_s16 + $0x38] sm:$0xff] %vm739_vm2, %v714_v19  ;;  %v730_v25 = vmax.f32 %v698_v20, 0.0  ;;  %v646_v26 = vmul.f32 %v888_v3, %v1111_v2  ;;  %v534_v27 = vpop.f32.mrb[9].mxu0 }
  0xff   : > { %760 = vst.msk [vmem:[%s1128_s16 + $0xa0] sm:$0xff] %vm739_vm2, %v727_v21  ;;  %745 = vst.msk [vmem:[%s1128_s16 + $0x28] sm:$0xff] %vm739_vm2, %v712_v22  ;;  %v728_v28 = vmax.f32 %v696_v23, 0.0  ;;  %v904_v29 = vpop.f32.mrb[8].mxu1  ;;  %v644_v30 = vmul.f32 %v1111_v2, %v534_v27  ;;  %v889_v31 = vpop.f32.mrb[10].mxu0 }
 0x100   : > { %763 = vst.msk [vmem:[%s1128_s16 + $0xb8] sm:$0xff] %vm739_vm2, %v730_v25  ;;  %v685_v32 = vadd.f32 %v1116_v24, %v646_v26  ;;  %v662_v33 = vmul.f32 %v904_v29, %v1111_v2  ;;  %v598_v34 = vpop.f32.mrb[9].mxu1  ;;  %v647_v35 = vmul.f32 %v889_v31, %v1111_v2  ;;  %v537_v36 = vpop.f32.mrb[11].mxu0 }
 0x101   : > { %761 = vst.msk [vmem:[%s1128_s16 + $0xa8] sm:$0xff] %vm739_vm2, %v728_v28  ;;  %v683_v37 = vadd.f32 %v1116_v24, %v644_v30  ;;  %v660_v38 = vmul.f32 %v1111_v2, %v598_v34  ;;  %v905_v39 = vpop.f32.mrb[10].mxu1  ;;  %v645_v40 = vmul.f32 %v1111_v2, %v537_v36 }
 0x102   : > { %v717_v41 = vmax.f32 %v685_v32, 0.0  ;;  %v701_v42 = vadd.f32 %v1116_v24, %v662_v33  ;;  %v686_v43 = vadd.f32 %v1116_v24, %v647_v35  ;;  %v663_v44 = vmul.f32 %v905_v39, %v1111_v2  ;;  %v601_v45 = vpop.f32.mrb[11].mxu1 }
 0x103   : > { %v715_v46 = vmax.f32 %v683_v37, 0.0  ;;  %v699_v47 = vadd.f32 %v1116_v24, %v660_v38  ;;  %v684_v48 = vadd.f32 %v1116_v24, %v645_v40  ;;  %v661_v49 = vmul.f32 %v1111_v2, %v601_v45 }
 0x104   : > { %750 = vst.msk [vmem:[%s1128_s16 + $0x50] sm:$0xff] %vm739_vm2, %v717_v41  ;;  %v733_v50 = vmax.f32 %v701_v42, 0.0  ;;  %v718_v51 = vmax.f32 %v686_v43, 0.0  ;;  %v702_v52 = vadd.f32 %v1116_v24, %v663_v44 }
 0x105   : > { %748 = vst.msk [vmem:[%s1128_s16 + $0x40] sm:$0xff] %vm739_vm2, %v715_v46  ;;  %v731_v53 = vmax.f32 %v699_v47, 0.0  ;;  %v716_v54 = vmax.f32 %v684_v48, 0.0  ;;  %v700_v55 = vadd.f32 %v1116_v24, %v661_v49  ;;  %v892_v56 = vpop.f32.mrb[12].mxu0 }
 0x106   : > { %766 = vst.msk [vmem:[%s1128_s16 + $0xd0] sm:$0xff] %vm739_vm2, %v733_v50  ;;  %751 = vst.msk [vmem:[%s1128_s16 + $0x58] sm:$0xff] %vm739_vm2, %v718_v51  ;;  %v734_v57 = vmax.f32 %v702_v52, 0.0  ;;  %v650_v58 = vmul.f32 %v892_v56, %v1111_v2  ;;  %v550_v59 = vpop.f32.mrb[13].mxu0 }
 0x107   : > { %764 = vst.msk [vmem:[%s1128_s16 + $0xc0] sm:$0xff] %vm739_vm2, %v731_v53  ;;  %749 = vst.msk [vmem:[%s1128_s16 + $0x48] sm:$0xff] %vm739_vm2, %v716_v54  ;;  %v732_v60 = vmax.f32 %v700_v55, 0.0  ;;  %v908_v61 = vpop.f32.mrb[12].mxu1  ;;  %v648_v62 = vmul.f32 %v1111_v2, %v550_v59  ;;  %v893_v63 = vpop.f32.mrb[14].mxu0 }
 0x108   : > { %767 = vst.msk [vmem:[%s1128_s16 + $0xd8] sm:$0xff] %vm739_vm2, %v734_v57  ;;  %v689_v0 = vadd.f32 %v1116_v24, %v650_v58  ;;  %v666_v1 = vmul.f32 %v908_v61, %v1111_v2  ;;  %v614_v4 = vpop.f32.mrb[13].mxu1  ;;  %v651_v5 = vmul.f32 %v893_v63, %v1111_v2  ;;  %v553_v6 = vpop.f32.mrb[15].mxu0 }
 0x109   : > { %765 = vst.msk [vmem:[%s1128_s16 + $0xc8] sm:$0xff] %vm739_vm2, %v732_v60  ;;  %v687_v7 = vadd.f32 %v1116_v24, %v648_v62  ;;  %v664_v8 = vmul.f32 %v1111_v2, %v614_v4  ;;  %v909_v9 = vpop.f32.mrb[14].mxu1  ;;  %v649_v10 = vmul.f32 %v1111_v2, %v553_v6 }
 0x10a   : > { %v721_v11 = vmax.f32 %v689_v0, 0.0  ;;  %v705_v12 = vadd.f32 %v1116_v24, %v666_v1  ;;  %v690_v13 = vadd.f32 %v1116_v24, %v651_v5  ;;  %v667_v14 = vmul.f32 %v909_v9, %v1111_v2  ;;  %v617_v15 = vpop.f32.mrb[15].mxu1 }
 0x10b   : > { %v719_v16 = vmax.f32 %v687_v7, 0.0  ;;  %v703_v17 = vadd.f32 %v1116_v24, %v664_v8  ;;  %v688_v18 = vadd.f32 %v1116_v24, %v649_v10  ;;  %v665_v19 = vmul.f32 %v1111_v2, %v617_v15 }
 0x10c   : > { %754 = vst.msk [vmem:[%s1128_s16 + $0x70] sm:$0xff] %vm739_vm2, %v721_v11  ;;  %v737_v20 = vmax.f32 %v705_v12, 0.0  ;;  %v722_v21 = vmax.f32 %v690_v13, 0.0  ;;  %v706_v22 = vadd.f32 %v1116_v24, %v667_v14 }
 0x10d   : > { %752 = vst.msk [vmem:[%s1128_s16 + $0x60] sm:$0xff] %vm739_vm2, %v719_v16  ;;  %v735_v23 = vmax.f32 %v703_v17, 0.0  ;;  %v720_v3 = vmax.f32 %v688_v18, 0.0  ;;  %v704_v25 = vadd.f32 %v1116_v24, %v665_v19 }
 0x10e   : > { %770 = vst.msk [vmem:[%s1128_s16 + $0xf0] sm:$0xff] %vm739_vm2, %v737_v20  ;;  %755 = vst.msk [vmem:[%s1128_s16 + $0x78] sm:$0xff] %vm739_vm2, %v722_v21  ;;  %v738_v26 = vmax.f32 %v706_v22, 0.0 }
 0x10f   : > { %768 = vst.msk [vmem:[%s1128_s16 + $0xe0] sm:$0xff] %vm739_vm2, %v735_v23  ;;  %753 = vst.msk [vmem:[%s1128_s16 + $0x68] sm:$0xff] %vm739_vm2, %v720_v3  ;;  %v736_v2 = vmax.f32 %v704_v25, 0.0 }
 0x110   : > { %771 = vst.msk [vmem:[%s1128_s16 + $0xf8] sm:$0xff] %vm739_vm2, %v738_v26 }
 0x111   : > { %769 = vst.msk [vmem:[%s1128_s16 + $0xe8] sm:$0xff] %vm739_vm2, %v736_v2 }
 0x112 PF: > { %s16_s21 = sadd.s32 1, %s928_s21  }
 0x113   : > { %p13_p4 = scmp.ge.s32.totalorder %s16_s21, 4  }
 0x115   :  { %15 = sbr.rel (!%p13_p4) target bundleno = 1 (0x1), region = 74 }

// kernel: dense_bottleneck_forward.3
= control target key start
LH: loop header
LB: loop body
LE: loop exit
PB: predicated region body
PF: predicated region fallthrough
CT: control target
= control target key end

     0   :  { %s5545_s9 = smov 0   ;;  %s6809_s0 = inlined_call_operand.vmem [shape: f32[2,396,32], index: 0, kind: input, shape index: {}]   ;;  %s6810_s1 = inlined_call_operand.vmem [shape: bf16[9,32,8], index: 1, kind: input, shape index: {}]   ;;  %s6811_s2 = inlined_call_operand.vmem [shape: f32[2,324,8], index: 2, kind: output, shape index: {}]  }
   0x1 LB: > { %s3608_s10 = sadd.s32 4294967295, %s5526_s9   ;;  %p3612_p0 = scmp.ge.s32.totalorder %s5526_s9, 1  ;;  %s5526_s9 = sphi %s5545_s9, %s12_s9  }
   0x2   : > { %p112_p1 = scmp.lt.s32.totalorder %s5526_s9, 3 }
   0x4   : > { %p113_p2 = pnand %p3612_p0, %p112_p1 }
   0x5   : > { %v5500_v0 = vld [vmem:[%s6810_s1 + $0x10] sm:$0xff] (!%p113_p2)   ;;  %v5528_v1 = vmov (!%p113_p2), 0.0   ;;  %v5501_v2 = vld [vmem:[%s6810_s1 + $0x40] sm:$0xff] (!%p113_p2)   ;;  %v5502_v3 = vld [vmem:[%s6810_s1 + $0x18] sm:$0xff] (!%p113_p2)   ;;  %vm5529_vm0 = vmmov (!%p113_p2), 0   ;;  %p134_p3 = scmp.lt.s32.totalorder (!%p113_p2), %s3608_s10, 1 }
   0x6   : > { %116 = sbr.rel (%p113_p2) target bundleno = 988 (0x3dc), region = 28  ;;  %4063 = vmatprep.subr.bf16.mxu1 (!%p113_p2), %v5528_v1  ;;  %4415 = vmatprep.subr.bf16.mxu0 (!%p113_p2), %v5528_v1  ;;  %v5503_v4 = vld [vmem:[%s6810_s1 + $0x48] sm:$0xff] (!%p113_p2)   ;;  %vm290_vm1 = vcmask (!%p113_p2), 261120   ;;  %v5504_v10 = vld [vmem:[%s6810_s1 + $0x50] sm:$0xff] (!%p113_p2)   ;;  %v5505_v12 = vld [vmem:[%s6810_s1] sm:$0xff] (!%p113_p2)   ;;  %vm3510_vm2 = vcmask (!%p113_p2), 64512  }
   0x7   : > { %4064 = vmatpush3.bf16.msra.mxu1 (!%p113_p2), %v5500_v0  ;;  %4067 = vmatprep.mubr.msk.bf16.mxu1 (!%p113_p2), %vm5529_vm0, %v5528_v1  ;;  %v5506_v17 = vld [vmem:[%s6810_s1 + $0x58] sm:$0xff] (!%p113_p2)   ;;  %v5508_v18 = vld [vmem:[%s6810_s1 + $0x8] sm:$0xff] (!%p113_p2)   ;;  %vm3551_vm3 = vcmask (!%p113_p2), 60416  }
   0x8   : > { %4416 = vmatpush3.bf16.msra.mxu0 (!%p113_p2), %v5501_v2  ;;  %4065 = vmatprep.subr.bf16.mxu1 (!%p113_p2), %v5528_v1 }
   0x9   : > { %4417 = vmatprep.subr.bf16.mxu0 (!%p113_p2), %v5528_v1  ;;  %4419 = vmatprep.mubr.msk.bf16.mxu0 (!%p113_p2), %vm5529_vm0, %v5528_v1 }
   0xb   : > { %4066 = vmatpush3.bf16.msra.mxu1 (!%p113_p2), %v5502_v3 }
   0xc   : > { %4418 = vmatpush3.bf16.msra.mxu0 (!%p113_p2), %v5503_v4  ;;  %4151 = vmatprep.subr.bf16.mxu1 (!%p113_p2), %v5528_v1 }
   0xd   : > { %s6813_s10 = smov (!%p134_p3, %s3608_s10), 1  ;;  %4503 = vmatprep.subr.bf16.mxu0 %v5528_v1 }
   0xe   : > { %s5488_s19 = smul.u32 400, %s6813_s10 }
  0x10   : > { %s5580_s22 = scalar_lea.vmem %s6809_s0, %s5488_s19 }
  0x11   : > { %v211_v5 = vld [vmem:[%s5580_s22 + $0x12] sm:$0xff]  ;;  %v212_v6 = vld [vmem:[%s5580_s22 + $0x1a] sm:$0xff]  ;;  %v1595_v7 = vld [vmem:[%s5580_s22 + $0x24] sm:$0xff] }
  0x12   : > { %v252_v8 = vpack.c.bf16 %v212_v6, %v211_v5  ;;  %v1596_v9 = vld [vmem:[%s5580_s22 + $0x2c] sm:$0xff]  ;;  %v213_v13 = vld [vmem:[%s5580_s22 + $0x22] sm:$0xff]  ;;  %v1597_v15 = vld [vmem:[%s5580_s22 + $0x34] sm:$0xff] }
  0x13   : > { %v1636_v11 = vpack.c.bf16 %v1596_v9, %v1595_v7  ;;  %v214_v14 = vld [vmem:[%s5580_s22 + $0x2a] sm:$0xff]  ;;  %v1598_v16 = vld [vmem:[%s5580_s22 + $0x3c] sm:$0xff]  ;;  %v215_v21 = vld [vmem:[%s5580_s22 + $0x32] sm:$0xff] }
  0x14   : > { %4068 = vmatmul.mubr.msk.bf16.vlgmr.msra.gmra.mrb[0].mxu1 %vm290_vm1, %v252_v8  ;;  %v253_v19 = vpack.c.bf16 %v214_v14, %v213_v13  ;;  %v1637_v20 = vpack.c.bf16 %v1598_v16, %v1597_v15  ;;  %v216_v22 = vld [vmem:[%s5580_s22 + $0x3a] sm:$0xff]  ;;  %v1599_v23 = vld [vmem:[%s5580_s22 + $0x44] sm:$0xff]  ;;  %v1600_v24 = vld [vmem:[%s5580_s22 + $0x4c] sm:$0xff] }
  0x15   : > { %4420 = vmatmul.mubr.msk.bf16.vlgmr.msra.gmra.mrb[0].mxu0 %vm290_vm1, %v1636_v11  ;;  %4071 = vmatprep.mubr.msk.bf16.mxu1 %vm5529_vm0, %v5528_v1  ;;  %v254_v25 = vpack.c.bf16 %v216_v22, %v215_v21  ;;  %v1638_v26 = vpack.c.bf16 %v1600_v24, %v1599_v23  ;;  %v217_v27 = vld [vmem:[%s5580_s22 + $0x42] sm:$0xff]  ;;  %v218_v28 = vld [vmem:[%s5580_s22 + $0x4a] sm:$0xff]  ;;  %v1601_v29 = vld [vmem:[%s5580_s22 + $0x54] sm:$0xff] }
  0x16   : > { %4504 = vmatpush3.bf16.msra.mxu0 %v5504_v10  ;;  %4423 = vmatprep.mubr.msk.bf16.mxu0 %vm5529_vm0, %v5528_v1  ;;  %v1602_v30 = vld [vmem:[%s5580_s22 + $0x5c] sm:$0xff]  ;;  %v255_v31 = vpack.c.bf16 %v218_v28, %v217_v27  ;;  %v219_v33 = vld [vmem:[%s5580_s22 + $0x52] sm:$0xff]  ;;  %v1603_v35 = vld [vmem:[%s5580_s22 + $0x64] sm:$0xff] }
  0x17   : > { %4152 = vmatpush3.bf16.msra.mxu1 %v5505_v12  ;;  %4505 = vmatprep.subr.bf16.mxu0 %v5528_v1  ;;  %v1639_v32 = vpack.c.bf16 %v1602_v30, %v1601_v29  ;;  %v220_v34 = vld [vmem:[%s5580_s22 + $0x5a] sm:$0xff]  ;;  %v1604_v36 = vld [vmem:[%s5580_s22 + $0x6c] sm:$0xff]  ;;  %v221_v39 = vld [vmem:[%s5580_s22 + $0x62] sm:$0xff] }
  0x18   : > { %4153 = vmatprep.subr.bf16.mxu1 %v5528_v1  ;;  %v256_v37 = vpack.c.bf16 %v220_v34, %v219_v33  ;;  %v1640_v38 = vpack.c.bf16 %v1604_v36, %v1603_v35  ;;  %v222_v40 = vld [vmem:[%s5580_s22 + $0x6a] sm:$0xff]  ;;  %v1605_v41 = vld [vmem:[%s5580_s22 + $0x74] sm:$0xff]  ;;  %v1606_v42 = vld [vmem:[%s5580_s22 + $0x7c] sm:$0xff] }
  0x19   : > { %v257_v43 = vpack.c.bf16 %v222_v40, %v221_v39  ;;  %v1641_v44 = vpack.c.bf16 %v1606_v42, %v1605_v41  ;;  %v223_v45 = vld [vmem:[%s5580_s22 + $0x72] sm:$0xff]  ;;  %v224_v46 = vld [vmem:[%s5580_s22 + $0x7a] sm:$0xff]  ;;  %v1607_v47 = vld [vmem:[%s5580_s22 + $0x84] sm:$0xff] }
  0x1a   : > { %4506 = vmatpush3.bf16.msra.mxu0 %v5506_v17  ;;  %v1608_v48 = vld [vmem:[%s5580_s22 + $0x8c] sm:$0xff]  ;;  %v258_v49 = vpack.c.bf16 %v224_v46, %v223_v45  ;;  %v225_v51 = vld [vmem:[%s5580_s22 + $0x82] sm:$0xff]  ;;  %v1609_v53 = vld [vmem:[%s5580_s22 + $0x94] sm:$0xff] }
  0x1b   : > { %4591 = vmatprep.subr.bf16.mxu0 %v5528_v1  ;;  %4154 = vmatpush3.bf16.msra.mxu1 %v5508_v18  ;;  %v1642_v50 = vpack.c.bf16 %v1608_v48, %v1607_v47  ;;  %v226_v52 = vld [vmem:[%s5580_s22 + $0x8a] sm:$0xff]  ;;  %v1610_v54 = vld [vmem:[%s5580_s22 + $0x9c] sm:$0xff]  ;;  %v227_v57 = vld [vmem:[%s5580_s22 + $0x92] sm:$0xff] }
  0x1c   : > { %4072 = vmatmul.mubr.msk.bf16.gmra.mrb[4].mxu1 %vm290_vm1, %v253_v19  ;;  %4239 = vmatprep.subr.bf16.mxu1 %v5528_v1  ;;  %v259_v55 = vpack.c.bf16 %v226_v52, %v225_v51  ;;  %v1643_v56 = vpack.c.bf16 %v1610_v54, %v1609_v53  ;;  %v228_v58 = vld [vmem:[%s5580_s22 + $0x9a] sm:$0xff]  ;;  %v1611_v59 = vld [vmem:[%s5580_s22 + $0xa4] sm:$0xff]  ;;  %v1612_v60 = vld [vmem:[%s5580_s22 + $0xac] sm:$0xff] }
  0x1d   : > { %4424 = vmatmul.mubr.msk.bf16.gmra.mrb[4].mxu0 %vm290_vm1, %v1637_v20  ;;  %4075 = vmatprep.mubr.msk.bf16.mxu1 %vm5529_vm0, %v5528_v1  ;;  %v260_v61 = vpack.c.bf16 %v228_v58, %v227_v57  ;;  %v1644_v62 = vpack.c.bf16 %v1612_v60, %v1611_v59  ;;  %v229_v63 = vld [vmem:[%s5580_s22 + $0xa2] sm:$0xff]  ;;  %v230_v0 = vld [vmem:[%s5580_s22 + $0xaa] sm:$0xff]  ;;  %v1613_v2 = vld [vmem:[%s5580_s22 + $0xb4] sm:$0xff] }
  0x1e   : > { %4427 = vmatprep.mubr.msk.bf16.mxu0 %vm5529_vm0, %v5528_v1  ;;  %v1614_v3 = vld [vmem:[%s5580_s22 + $0xbc] sm:$0xff]  ;;  %v261_v4 = vpack.c.bf16 %v230_v0, %v229_v63  ;;  %v231_v6 = vld [vmem:[%s5580_s22 + $0xb2] sm:$0xff]  ;;  %v1615_v8 = vld [vmem:[%s5580_s22 + $0xc4] sm:$0xff] }
  0x1f   : > { %v1645_v5 = vpack.c.bf16 %v1614_v3, %v1613_v2  ;;  %v232_v7 = vld [vmem:[%s5580_s22 + $0xba] sm:$0xff]  ;;  %v1616_v9 = vld [vmem:[%s5580_s22 + $0xcc] sm:$0xff]  ;;  %v233_v12 = vld [vmem:[%s5580_s22 + $0xc2] sm:$0xff] }
  0x20   : > { %v262_v10 = vpack.c.bf16 %v232_v7, %v231_v6  ;;  %v1646_v11 = vpack.c.bf16 %v1616_v9, %v1615_v8  ;;  %v234_v13 = vld [vmem:[%s5580_s22 + $0xca] sm:$0xff]  ;;  %v5507_v18 = vld [vmem:[%s6810_s1 + $0x60] sm:$0xff]   ;;  %v235_v19 = vld [vmem:[%s5580_s22 + $0xd2] sm:$0xff] }
  0x21   : > { %v1978_v14 = vld [vmem:[%s5580_s22 + $0x25] sm:$0xff]  ;;  %v1979_v15 = vld [vmem:[%s5580_s22 + $0x2d] sm:$0xff]  ;;  %v263_v16 = vpack.c.bf16 %v234_v13, %v233_v12  ;;  %v236_v20 = vld [vmem:[%s5580_s22 + $0xda] sm:$0xff] }
  0x22   : > { %v2019_v17 = vpack.c.bf16 %v1979_v15, %v1978_v14  ;;  %v1980_v21 = vld [vmem:[%s5580_s22 + $0x35] sm:$0xff]  ;;  %v1981_v22 = vld [vmem:[%s5580_s22 + $0x3d] sm:$0xff]  ;;  %v5509_v23 = vld [vmem:[%s6810_s1 + $0x68] sm:$0xff]   ;;  %v264_v24 = vpack.c.bf16 %v236_v20, %v235_v19 }
  0x23   : > { %v238_v27 = vld [vmem:[%s5580_s22 + $0xea] sm:$0xff]  ;;  %v240_v33 = vld [vmem:[%s5580_s22 + $0xfa] sm:$0xff] }
  0x24   : > { %4076 = vmatmul.mubr.msk.bf16.gmra.mrb[8].mxu1 %vm290_vm1, %v254_v25  ;;  %v5730_v25 = vpack.c.bf16 %v1981_v22, %v1980_v21  ;;  %v1982_v28 = vld [vmem:[%s5580_s22 + $0x45] sm:$0xff]  ;;  %v1983_v29 = vld [vmem:[%s5580_s22 + $0x4d] sm:$0xff]  ;;  %v1984_v34 = vld [vmem:[%s5580_s22 + $0x55] sm:$0xff] }
  0x25   : > { %4428 = vmatmul.mubr.msk.bf16.gmra.mrb[8].mxu0 %vm290_vm1, %v1638_v26  ;;  %4079 = vmatprep.mubr.msk.bf16.mxu1 %vm5529_vm0, %v5528_v1  ;;  %v237_v26 = vld [vmem:[%s5580_s22 + $0xe2] sm:$0xff]  ;;  %v242_v39 = vld [vmem:[%s5580_s22 + $0x10a] sm:$0xff]  ;;  %v244_v45 = vld [vmem:[%s5580_s22 + $0x11a] sm:$0xff] }
  0x26   : > { %4431 = vmatprep.mubr.msk.bf16.mxu0 %vm5529_vm0, %v5528_v1  ;;  %v265_v30 = vpack.c.bf16 %v238_v27, %v237_v26  ;;  %v1985_v35 = vld [vmem:[%s5580_s22 + $0x5d] sm:$0xff]  ;;  %v1986_v40 = vld [vmem:[%s5580_s22 + $0x65] sm:$0xff]  ;;  %v1987_v41 = vld [vmem:[%s5580_s22 + $0x6d] sm:$0xff] }
  0x27   : > { %v1988_v46 = vld [vmem:[%s5580_s22 + $0x75] sm:$0xff]  ;;  %v1989_v47 = vld [vmem:[%s5580_s22 + $0x7d] sm:$0xff]  ;;  %v246_v51 = vld [vmem:[%s5580_s22 + $0x12a] sm:$0xff] }
  0x28   : > { %v1990_v52 = vld [vmem:[%s5580_s22 + $0x85] sm:$0xff]  ;;  %v1991_v53 = vld [vmem:[%s5580_s22 + $0x8d] sm:$0xff]  ;;  %v248_v57 = vld [vmem:[%s5580_s22 + $0x13a] sm:$0xff] }
  0x29   : > { %v1992_v58 = vld [vmem:[%s5580_s22 + $0x95] sm:$0xff]  ;;  %v1993_v59 = vld [vmem:[%s5580_s22 + $0x9d] sm:$0xff]  ;;  %v250_v63 = vld [vmem:[%s5580_s22 + $0x14a] sm:$0xff] }
  0x2a   : > { %v1994_v0 = vld [vmem:[%s5580_s22 + $0xa5] sm:$0xff]  ;;  %v1995_v2 = vld [vmem:[%s5580_s22 + $0xad] sm:$0xff]  ;;  %v1996_v6 = vld [vmem:[%s5580_s22 + $0xb5] sm:$0xff] }
  0x2b   : > { %v1997_v7 = vld [vmem:[%s5580_s22 + $0xbd] sm:$0xff]  ;;  %v1998_v12 = vld [vmem:[%s5580_s22 + $0xc5] sm:$0xff]  ;;  %v1999_v13 = vld [vmem:[%s5580_s22 + $0xcd] sm:$0xff] }
  0x2c   : > { %4080 = vmatmul.mubr.msk.bf16.gmra.mrb[12].mxu1 %vm290_vm1, %v255_v31  ;;  %v5744_v31 = vpack.c.bf16 %v1983_v29, %v1982_v28  ;;  %v5834_v9 = vpack.c.bf16 %v1997_v7, %v1996_v6  ;;  %v5847_v15 = vpack.c.bf16 %v1999_v13, %v1998_v12  ;;  %v2000_v19 = vld [vmem:[%s5580_s22 + $0xd5] sm:$0xff]  ;;  %v2001_v20 = vld [vmem:[%s5580_s22 + $0xdd] sm:$0xff]  ;;  %v5512_v21 = vld [vmem:[%s6810_s1 + $0x28] sm:$0xff]  }
  0x2d   : > { %4432 = vmatmul.mubr.msk.bf16.gmra.mrb[12].mxu0 %vm290_vm1, %v1639_v32  ;;  %4083 = vmatprep.mubr.msk.bf16.mxu1 %vm5529_vm0, %v5528_v1  ;;  %v239_v32 = vld [vmem:[%s5580_s22 + $0xf2] sm:$0xff]  ;;  %v2002_v27 = vld [vmem:[%s5580_s22 + $0xe5] sm:$0xff] }
  0x2e   : > { %4435 = vmatprep.mubr.msk.bf16.mxu0 %vm5529_vm0, %v5528_v1  ;;  %v266_v36 = vpack.c.bf16 %v240_v33, %v239_v32  ;;  %v150_v26 = vld [vmem:[%s5580_s22 + $0x39] sm:$0xff]  ;;  %v2003_v28 = vld [vmem:[%s5580_s22 + $0xed] sm:$0xff]  ;;  %v151_v32 = vld [vmem:[%s5580_s22 + $0x41] sm:$0xff] }
  0x2f   : > { %v152_v33 = vld [vmem:[%s5580_s22 + $0x49] sm:$0xff]  ;;  %v162_v6 = vld [vmem:[%s5580_s22 + $0x99] sm:$0xff]  ;;  %v163_v12 = vld [vmem:[%s5580_s22 + $0xa1] sm:$0xff] }
  0x30   : > { %v2014_v7 = vld [vmem:[%s5580_s22 + $0x145] sm:$0xff] }
  0x31   : > { %v164_v13 = vld [vmem:[%s5580_s22 + $0xa9] sm:$0xff] }
  0x34   : > { %4084 = vmatmul.mubr.msk.bf16.gmra.mrb[16].mxu1 %vm290_vm1, %v256_v37  ;;  %v5757_v37 = vpack.c.bf16 %v1985_v35, %v1984_v34  ;;  %v2004_v34 = vld [vmem:[%s5580_s22 + $0xf5] sm:$0xff]  ;;  %v2005_v35 = vld [vmem:[%s5580_s22 + $0xfd] sm:$0xff] }
  0x35   : > { %4436 = vmatmul.mubr.msk.bf16.gmra.mrb[16].mxu0 %vm290_vm1, %v1640_v38  ;;  %4087 = vmatprep.mubr.msk.bf16.mxu1 %vm5529_vm0, %v5528_v1  ;;  %v241_v38 = vld [vmem:[%s5580_s22 + $0x102] sm:$0xff] }
  0x36   : > { %4439 = vmatprep.mubr.msk.bf16.mxu0 %vm5529_vm0, %v5528_v1  ;;  %v267_v42 = vpack.c.bf16 %v242_v39, %v241_v38  ;;  %v5894_v38 = vpack.c.bf16 %v2005_v35, %v2004_v34  ;;  %v153_v39 = vld [vmem:[%s5580_s22 + $0x51] sm:$0xff] }
  0x37   : > { %v5513_v34 = vld [vmem:[%s6810_s1 + $0x78] sm:$0xff]  }
  0x3c   : > { %4088 = vmatmul.mubr.msk.bf16.gmra.mrb[20].mxu1 %vm290_vm1, %v257_v43  ;;  %v5770_v43 = vpack.c.bf16 %v1987_v41, %v1986_v40  ;;  %v154_v40 = vld [vmem:[%s5580_s22 + $0x59] sm:$0xff]  ;;  %v2006_v41 = vld [vmem:[%s5580_s22 + $0x105] sm:$0xff] }
  0x3d   : > { %4440 = vmatmul.mubr.msk.bf16.gmra.mrb[20].mxu0 %vm290_vm1, %v1641_v44  ;;  %4091 = vmatprep.mubr.msk.bf16.mxu1 %vm5529_vm0, %v5528_v1  ;;  %v243_v44 = vld [vmem:[%s5580_s22 + $0x112] sm:$0xff] }
  0x3e   : > { %4443 = vmatprep.mubr.msk.bf16.mxu0 %vm5529_vm0, %v5528_v1  ;;  %v268_v48 = vpack.c.bf16 %v244_v45, %v243_v44  ;;  %v190_v44 = vpack.c.bf16 %v154_v40, %v153_v39  ;;  %v174_v40 = vld [vmem:[%s5580_s22 + $0xf9] sm:$0xff] }
  0x44   : > { %4092 = vmatmul.mubr.msk.bf16.gmra.mrb[24].mxu1 %vm290_vm1, %v258_v49  ;;  %v5783_v49 = vpack.c.bf16 %v1989_v47, %v1988_v46  ;;  %v155_v46 = vld [vmem:[%s5580_s22 + $0x61] sm:$0xff]  ;;  %v156_v47 = vld [vmem:[%s5580_s22 + $0x69] sm:$0xff] }
  0x45   : > { %4444 = vmatmul.mubr.msk.bf16.gmra.mrb[24].mxu0 %vm290_vm1, %v1642_v50  ;;  %4095 = vmatprep.mubr.msk.bf16.mxu1 %vm5529_vm0, %v5528_v1  ;;  %v245_v50 = vld [vmem:[%s5580_s22 + $0x122] sm:$0xff] }
  0x46   : > { %4447 = vmatprep.mubr.msk.bf16.mxu0 %vm5529_vm0, %v5528_v1  ;;  %v269_v54 = vpack.c.bf16 %v246_v51, %v245_v50  ;;  %v2009_v50 = vld [vmem:[%s5580_s22 + $0x11d] sm:$0xff]  ;;  %v191_v51 = vpack.c.bf16 %v156_v47, %v155_v46 }
  0x47   : > { %v178_v46 = vld [vmem:[%s5580_s22 + $0x119] sm:$0xff] }
  0x4c   : > { %4096 = vmatmul.mubr.msk.bf16.gmra.mrb[28].mxu1 %vm290_vm1, %v259_v55  ;;  %v5796_v55 = vpack.c.bf16 %v1991_v53, %v1990_v52  ;;  %v157_v53 = vld [vmem:[%s5580_s22 + $0x71] sm:$0xff] }
  0x4d   : > { %4448 = vmatmul.mubr.msk.bf16.gmra.mrb[28].mxu0 %vm290_vm1, %v1643_v56  ;;  %4099 = vmatprep.mubr.msk.bf16.mxu1 %vm5529_vm0, %v5528_v1  ;;  %v247_v56 = vld [vmem:[%s5580_s22 + $0x132] sm:$0xff] }
  0x4e   : > { %4451 = vmatprep.mubr.msk.bf16.mxu0 %vm5529_vm0, %v5528_v1  ;;  %v270_v60 = vpack.c.bf16 %v248_v57, %v247_v56  ;;  %v2010_v56 = vld [vmem:[%s5580_s22 + $0x125] sm:$0xff]  ;;  %v2011_v57 = vld [vmem:[%s5580_s22 + $0x12d] sm:$0xff] }
  0x54   : > { %4100 = vmatmul.mubr.msk.bf16.gmra.mrb[32].mxu1 %vm290_vm1, %v260_v61  ;;  %v5809_v61 = vpack.c.bf16 %v1993_v59, %v1992_v58  ;;  %v5933_v59 = vpack.c.bf16 %v2011_v57, %v2010_v56 }
  0x55   : > { %4452 = vmatmul.mubr.msk.bf16.gmra.mrb[32].mxu0 %vm290_vm1, %v1644_v62  ;;  %4103 = vmatprep.mubr.msk.bf16.mxu1 %vm5529_vm0, %v5528_v1  ;;  %v249_v62 = vld [vmem:[%s5580_s22 + $0x142] sm:$0xff] }
  0x56   : > { %4455 = vmatprep.mubr.msk.bf16.mxu0 %vm5529_vm0, %v5528_v1  ;;  %v271_v3 = vpack.c.bf16 %v250_v63, %v249_v62  ;;  %v160_v62 = vld [vmem:[%s5580_s22 + $0x89] sm:$0xff]  ;;  %v2012_v63 = vld [vmem:[%s5580_s22 + $0x135] sm:$0xff] }
  0x5c   : > { %4104 = vmatmul.mubr.msk.bf16.gmra.mrb[36].mxu1 %vm290_vm1, %v261_v4  ;;  %v5822_v4 = vpack.c.bf16 %v1995_v2, %v1994_v0  ;;  %v2013_v0 = vld [vmem:[%s5580_s22 + $0x13d] sm:$0xff] }
  0x5d   : > { %4456 = vmatmul.mubr.msk.bf16.gmra.mrb[36].mxu0 %vm290_vm1, %v1645_v5  ;;  %4107 = vmatprep.mubr.msk.bf16.mxu1 %vm5529_vm0, %v5528_v1  ;;  %v251_v5 = vld [vmem:[%s5580_s22 + $0x152] sm:$0xf] }
  0x5e   : > { %4459 = vmatprep.mubr.msk.bf16.mxu0 %vm5529_vm0, %v5528_v1  ;;  %v272_v8 = vpack.c.bf16 %v251_v5, %v251_v5  ;;  %v161_v5 = vld [vmem:[%s5580_s22 + $0x91] sm:$0xff] }
  0x64   : > { %4108 = vmatmul.mubr.msk.bf16.gmra.mrb[40].mxu1 %vm290_vm1, %v262_v10  ;;  %v145_v10 = vld [vmem:[%s5580_s22 + $0x11] sm:$0xff] }
  0x65   : > { %4460 = vmatmul.mubr.msk.bf16.gmra.mrb[40].mxu0 %vm290_vm1, %v1646_v11  ;;  %4111 = vmatprep.mubr.msk.bf16.mxu1 %vm5529_vm0, %v5528_v1  ;;  %v146_v11 = vld [vmem:[%s5580_s22 + $0x19] sm:$0xff] }
  0x66   : > { %4507 = vmatprep.mubr.msk.bf16.mxu0 %vm5529_vm0, %v5528_v1  ;;  %v186_v14 = vpack.c.bf16 %v146_v11, %v145_v10  ;;  %v194_v10 = vpack.c.bf16 %v162_v6, %v161_v5  ;;  %v834_v5 = vld [vmem:[%s5580_s22 + $0x3b] sm:$0xff] }
  0x6c   : > { %4112 = vmatmul.mubr.msk.bf16.gmra.mrb[44].mxu1 %vm290_vm1, %v263_v16  ;;  %v5510_v16 = vld [vmem:[%s6810_s1 + $0x20] sm:$0xff]  }
  0x6d   : > { %4508 = vmatmul.mubr.msk.bf16.vlgmr.msra.gmra.mrb[0].mxu0 %vm290_vm1, %v2019_v17  ;;  %4115 = vmatprep.mubr.msk.bf16.mxu1 %vm5529_vm0, %v5528_v1  ;;  %v147_v17 = vld [vmem:[%s5580_s22 + $0x21] sm:$0xff] }
  0x6e   : > { %4592 = vmatpush3.bf16.msra.mxu0 %v5507_v18  ;;  %4511 = vmatprep.mubr.msk.bf16.mxu0 %vm5529_vm0, %v5528_v1  ;;  %v148_v18 = vld [vmem:[%s5580_s22 + $0x29] sm:$0xff] }
  0x6f   : > { %4593 = vmatprep.subr.bf16.mxu0 %v5528_v1  ;;  %v187_v22 = vpack.c.bf16 %v148_v18, %v147_v17  ;;  %v195_v17 = vpack.c.bf16 %v164_v13, %v163_v12  ;;  %v840_v13 = vld [vmem:[%s5580_s22 + $0x6b] sm:$0xff] }
  0x72   : > { %4594 = vmatpush3.bf16.msra.mxu0 %v5509_v23  ;;  %v5867_v23 = vpack.c.bf16 %v2001_v20, %v2000_v19  ;;  %v165_v19 = vld [vmem:[%s5580_s22 + $0xb1] sm:$0xff]  ;;  %v166_v20 = vld [vmem:[%s5580_s22 + $0xb9] sm:$0xff] }
  0x73   : > { %4679 = vmatprep.subr.bf16.mxu0 %v5528_v1 }
  0x74   : > { %4116 = vmatmul.mubr.msk.bf16.gmra.mrb[48].mxu1 %vm290_vm1, %v264_v24  ;;  %v149_v24 = vld [vmem:[%s5580_s22 + $0x31] sm:$0xff] }
  0x75   : > { %4512 = vmatmul.mubr.msk.bf16.gmra.mrb[4].mxu0 %vm290_vm1, %v5730_v25  ;;  %4119 = vmatprep.mubr.msk.bf16.mxu1 %vm5529_vm0, %v5528_v1  ;;  %v188_v29 = vpack.c.bf16 %v150_v26, %v149_v24  ;;  %v167_v26 = vld [vmem:[%s5580_s22 + $0xc1] sm:$0xff] }
  0x76   : > { %4515 = vmatprep.mubr.msk.bf16.mxu0 %vm5529_vm0, %v5528_v1 }
  0x7c   : > { %4120 = vmatmul.mubr.msk.bf16.gmra.mrb[52].mxu1 %vm290_vm1, %v265_v30  ;;  %v5881_v30 = vpack.c.bf16 %v2003_v28, %v2002_v27  ;;  %v168_v27 = vld [vmem:[%s5580_s22 + $0xc9] sm:$0xff] }
  0x7d   : > { %4516 = vmatmul.mubr.msk.bf16.gmra.mrb[8].mxu0 %vm290_vm1, %v5744_v31  ;;  %4123 = vmatprep.mubr.msk.bf16.mxu1 %vm5529_vm0, %v5528_v1  ;;  %v197_v28 = vpack.c.bf16 %v168_v27, %v167_v26  ;;  %v2399_v26 = vld [vmem:[%s5580_s22 + $0x165] sm:$0xff]  ;;  %v2400_v27 = vld [vmem:[%s5580_s22 + $0x16d] sm:$0xff] }
  0x7e   : > { %4519 = vmatprep.mubr.msk.bf16.mxu0 %vm5529_vm0, %v5528_v1 }
  0x84   : > { %4124 = vmatmul.mubr.msk.bf16.gmra.mrb[56].mxu1 %vm290_vm1, %v266_v36  ;;  %v189_v36 = vpack.c.bf16 %v152_v33, %v151_v32  ;;  %v169_v32 = vld [vmem:[%s5580_s22 + $0xd1] sm:$0xff]  ;;  %v170_v33 = vld [vmem:[%s5580_s22 + $0xd9] sm:$0xff] }
  0x85   : > { %4520 = vmatmul.mubr.msk.bf16.gmra.mrb[12].mxu0 %vm290_vm1, %v5757_v37  ;;  %4127 = vmatprep.mubr.msk.bf16.mxu1 %vm5529_vm0, %v5528_v1  ;;  %v198_v35 = vpack.c.bf16 %v170_v33, %v169_v32  ;;  %v850_v32 = vld [vmem:[%s5580_s22 + $0xbb] sm:$0xff]  ;;  %v2401_v33 = vld [vmem:[%s5580_s22 + $0x175] sm:$0xf] }
  0x86   : > { %4523 = vmatprep.mubr.msk.bf16.mxu0 %vm5529_vm0, %v5528_v1 }
  0x8c   : > { %4128 = vmatmul.mubr.msk.bf16.gmra.mrb[60].mxu1 %vm290_vm1, %v267_v42  ;;  %v2007_v42 = vld [vmem:[%s5580_s22 + $0x10d] sm:$0xff] }
  0x8d   : > { %4524 = vmatmul.mubr.msk.bf16.gmra.mrb[16].mxu0 %vm290_vm1, %v5770_v43  ;;  %4131 = vmatprep.mubr.msk.bf16.mxu1 %vm5529_vm0, %v5528_v1  ;;  %v5907_v45 = vpack.c.bf16 %v2007_v42, %v2006_v41  ;;  %v176_v42 = vld [vmem:[%s5580_s22 + $0x109] sm:$0xff] }
  0x8e   : > { %4527 = vmatprep.mubr.msk.bf16.mxu0 %vm5529_vm0, %v5528_v1 }
  0x94   : > { %4132 = vmatmul.mubr.msk.bf16.gmra.mrb[64].mxu1 %vm290_vm1, %v268_v48  ;;  %v2008_v48 = vld [vmem:[%s5580_s22 + $0x115] sm:$0xff] }
  0x95   : > { %4528 = vmatmul.mubr.msk.bf16.gmra.mrb[20].mxu0 %vm290_vm1, %v5783_v49  ;;  %4135 = vmatprep.mubr.msk.bf16.mxu1 %vm5529_vm0, %v5528_v1  ;;  %v5920_v52 = vpack.c.bf16 %v2009_v50, %v2008_v48  ;;  %v180_v48 = vld [vmem:[%s5580_s22 + $0x129] sm:$0xff] }
  0x96   : > { %4531 = vmatprep.mubr.msk.bf16.mxu0 %vm5529_vm0, %v5528_v1 }
  0x9c   : > { %4136 = vmatmul.mubr.msk.bf16.gmra.mrb[68].mxu1 %vm290_vm1, %v269_v54  ;;  %v158_v54 = vld [vmem:[%s5580_s22 + $0x79] sm:$0xff] }
  0x9d   : > { %4532 = vmatmul.mubr.msk.bf16.gmra.mrb[24].mxu0 %vm290_vm1, %v5796_v55  ;;  %4139 = vmatprep.mubr.msk.bf16.mxu1 %vm5529_vm0, %v5528_v1  ;;  %v192_v58 = vpack.c.bf16 %v158_v54, %v157_v53  ;;  %v184_v54 = vld [vmem:[%s5580_s22 + $0x149] sm:$0xff] }
  0x9e   : > { %4535 = vmatprep.mubr.msk.bf16.mxu0 %vm5529_vm0, %v5528_v1 }
  0xa4   : > { %4140 = vmatmul.mubr.msk.bf16.gmra.mrb[72].mxu1 %vm290_vm1, %v270_v60  ;;  %v159_v60 = vld [vmem:[%s5580_s22 + $0x81] sm:$0xff] }
  0xa5   : > { %4536 = vmatmul.mubr.msk.bf16.gmra.mrb[28].mxu0 %vm290_vm1, %v5809_v61  ;;  %4143 = vmatprep.mubr.msk.bf16.mxu1 %vm5529_vm0, %v5528_v1  ;;  %v193_v2 = vpack.c.bf16 %v160_v62, %v159_v60  ;;  %v5514_v62 = vld [vmem:[%s6810_s1 + $0x30] sm:$0xff]  }
  0xa6   : > { %4539 = vmatprep.mubr.msk.bf16.mxu0 %vm5529_vm0, %v5528_v1 }
  0xac   : > { %4144 = vmatmul.mubr.msk.bf16.gmra.mrb[76].mxu1 %vm290_vm1, %v271_v3  ;;  %v5946_v3 = vpack.c.bf16 %v2013_v0, %v2012_v63  ;;  %v832_v63 = vld [vmem:[%s5580_s22 + $0x2b] sm:$0xff]  ;;  %v5516_v0 = vld [vmem:[%s6810_s1 + $0x38] sm:$0xff]  }
  0xad   : > { %4540 = vmatmul.mubr.msk.bf16.gmra.mrb[32].mxu0 %vm290_vm1, %v5822_v4  ;;  %4147 = vmatprep.mubr.msk.bf16.mxu1 %vm5529_vm0, %v5528_v1 }
  0xae   : > { %4543 = vmatprep.mubr.msk.bf16.mxu0 %vm5529_vm0, %v5528_v1 }
  0xb4   : > { %4148 = vmatmul.mubr.msk.bf16.gmra.mrb[80].mxu1 %vm290_vm1, %v272_v8  ;;  %v2015_v8 = vld [vmem:[%s5580_s22 + $0x14d] sm:$0xff] }
  0xb5   : > { %4544 = vmatmul.mubr.msk.bf16.gmra.mrb[36].mxu0 %vm290_vm1, %v5834_v9  ;;  %4155 = vmatprep.mubr.msk.bf16.mxu1 %vm5529_vm0, %v5528_v1  ;;  %v5959_v11 = vpack.c.bf16 %v2015_v8, %v2014_v7  ;;  %v836_v7 = vld [vmem:[%s5580_s22 + $0x4b] sm:$0xff] }
  0xb6   : > { %4547 = vmatprep.mubr.msk.bf16.mxu0 %vm5529_vm0, %v5528_v1 }
  0xbc   : > { %4156 = vmatmul.mubr.msk.bf16.vlgmr.msra.gmra.mrb[0].mxu1 %vm290_vm1, %v186_v14  ;;  %v2016_v14 = vld [vmem:[%s5580_s22 + $0x155] sm:$0xff] }
  0xbd   : > { %4548 = vmatmul.mubr.msk.bf16.gmra.mrb[40].mxu0 %vm290_vm1, %v5847_v15  ;;  %4159 = vmatprep.mubr.msk.bf16.mxu1 %vm5529_vm0, %v5528_v1 }
  0xbe   : > { %4551 = vmatprep.mubr.msk.bf16.mxu0 %vm5529_vm0, %v5528_v1  ;;  %4240 = vmatpush3.bf16.msra.mxu1 %v5510_v16  ;;  %v2017_v16 = vld [vmem:[%s5580_s22 + $0x15d] sm:$0xff] }
  0xbf   : > { %4241 = vmatprep.subr.bf16.mxu1 %v5528_v1  ;;  %v5972_v18 = vpack.c.bf16 %v2017_v16, %v2016_v14  ;;  %v842_v16 = vld [vmem:[%s5580_s22 + $0x7b] sm:$0xff] }
  0xc2   : > { %4242 = vmatpush3.bf16.msra.mxu1 %v5512_v21  ;;  %v2018_v21 = vld [vmem:[%s5580_s22 + $0x165] sm:$0xf] }
  0xc3   : > { %4327 = vmatprep.subr.bf16.mxu1 %v5528_v1  ;;  %v2039_v24 = vpack.c.bf16 %v2018_v21, %v2018_v21  ;;  %v846_v21 = vld [vmem:[%s5580_s22 + $0x9b] sm:$0xff] }
  0xc4   : > { %4160 = vmatmul.mubr.msk.bf16.gmra.mrb[4].mxu1 %vm290_vm1, %v187_v22  ;;  %v196_v22 = vpack.c.bf16 %v166_v20, %v165_v19  ;;  %v844_v19 = vld [vmem:[%s5580_s22 + $0x8b] sm:$0xff] }
  0xc5   : > { %4552 = vmatmul.mubr.msk.bf16.gmra.mrb[44].mxu0 %vm290_vm1, %v5867_v23  ;;  %4163 = vmatprep.mubr.msk.bf16.mxu1 %vm5529_vm0, %v5528_v1 }
  0xc6   : > { %4555 = vmatprep.mubr.msk.bf16.mxu0 %vm5529_vm0, %v5528_v1 }
  0xcc   : > { %4164 = vmatmul.mubr.msk.bf16.gmra.mrb[8].mxu1 %vm290_vm1, %v188_v29  ;;  %v5511_v29 = vld [vmem:[%s6810_s1 + $0x70] sm:$0xff]  }
  0xcd   : > { %4556 = vmatmul.mubr.msk.bf16.gmra.mrb[48].mxu0 %vm290_vm1, %v5881_v30  ;;  %4167 = vmatprep.mubr.msk.bf16.mxu1 %vm5529_vm0, %v5528_v1 }
  0xce   : > { %4559 = vmatprep.mubr.msk.bf16.mxu0 %vm5529_vm0, %v5528_v1 }
  0xd4   : > { %4168 = vmatmul.mubr.msk.bf16.gmra.mrb[12].mxu1 %vm290_vm1, %v189_v36  ;;  %v172_v36 = vld [vmem:[%s5580_s22 + $0xe9] sm:$0xff] }
  0xd5   : > { %4560 = vmatmul.mubr.msk.bf16.gmra.mrb[52].mxu0 %vm290_vm1, %v5894_v38  ;;  %4171 = vmatprep.mubr.msk.bf16.mxu1 %vm5529_vm0, %v5528_v1 }
  0xd6   : > { %4563 = vmatprep.mubr.msk.bf16.mxu0 %vm5529_vm0, %v5528_v1 }
  0xdc   : > { %4172 = vmatmul.mubr.msk.bf16.gmra.mrb[16].mxu1 %vm290_vm1, %v190_v44 }
  0xdd   : > { %4564 = vmatmul.mubr.msk.bf16.gmra.mrb[56].mxu0 %vm290_vm1, %v5907_v45  ;;  %4175 = vmatprep.mubr.msk.bf16.mxu1 %vm5529_vm0, %v5528_v1 }
  0xde   : > { %4567 = vmatprep.mubr.msk.bf16.mxu0 %vm5529_vm0, %v5528_v1 }
  0xe4   : > { %4176 = vmatmul.mubr.msk.bf16.gmra.mrb[20].mxu1 %vm290_vm1, %v191_v51  ;;  %v182_v51 = vld [vmem:[%s5580_s22 + $0x139] sm:$0xff] }
  0xe5   : > { %4568 = vmatmul.mubr.msk.bf16.gmra.mrb[60].mxu0 %vm290_vm1, %v5920_v52  ;;  %4179 = vmatprep.mubr.msk.bf16.mxu1 %vm5529_vm0, %v5528_v1 }
  0xe6   : > { %4571 = vmatprep.mubr.msk.bf16.mxu0 %vm5529_vm0, %v5528_v1 }
  0xec   : > { %4180 = vmatmul.mubr.msk.bf16.gmra.mrb[24].mxu1 %vm290_vm1, %v192_v58  ;;  %v829_v58 = vld [vmem:[%s5580_s22 + $0x13] sm:$0xff] }
  0xed   : > { %4572 = vmatmul.mubr.msk.bf16.gmra.mrb[64].mxu0 %vm290_vm1, %v5933_v59  ;;  %4183 = vmatprep.mubr.msk.bf16.mxu1 %vm5529_vm0, %v5528_v1 }
  0xee   : > { %4575 = vmatprep.mubr.msk.bf16.mxu0 %vm5529_vm0, %v5528_v1 }
  0xf4   : > { %4184 = vmatmul.mubr.msk.bf16.gmra.mrb[28].mxu1 %vm290_vm1, %v193_v2 }
  0xf5   : > { %4576 = vmatmul.mubr.msk.bf16.gmra.mrb[68].mxu0 %vm290_vm1, %v5946_v3  ;;  %4187 = vmatprep.mubr.msk.bf16.mxu1 %vm5529_vm0, %v5528_v1 }
  0xf6   : > { %4579 = vmatprep.mubr.msk.bf16.mxu0 %vm5529_vm0, %v5528_v1 }
  0xfc   : > { %4188 = vmatmul.mubr.msk.bf16.gmra.mrb[32].mxu1 %vm290_vm1, %v194_v10  ;;  %v838_v10 = vld [vmem:[%s5580_s22 + $0x5b] sm:$0xff] }
  0xfd   : > { %4580 = vmatmul.mubr.msk.bf16.gmra.mrb[72].mxu0 %vm290_vm1, %v5959_v11  ;;  %4191 = vmatprep.mubr.msk.bf16.mxu1 %vm5529_vm0, %v5528_v1 }
  0xfe   : > { %4583 = vmatprep.mubr.msk.bf16.mxu0 %vm5529_vm0, %v5528_v1 }
 0x104   : > { %4192 = vmatmul.mubr.msk.bf16.gmra.mrb[36].mxu1 %vm290_vm1, %v195_v17 }
 0x105   : > { %4584 = vmatmul.mubr.msk.bf16.gmra.mrb[76].mxu0 %vm290_vm1, %v5972_v18  ;;  %4195 = vmatprep.mubr.msk.bf16.mxu1 %vm5529_vm0, %v5528_v1 }
 0x106   : > { %4587 = vmatprep.mubr.msk.bf16.mxu0 %vm5529_vm0, %v5528_v1 }
 0x10c   : > { %4196 = vmatmul.mubr.msk.bf16.gmra.mrb[40].mxu1 %vm290_vm1, %v196_v22 }
 0x10d   : > { %4588 = vmatmul.mubr.msk.bf16.gmra.mrb[80].mxu0 %vm290_vm1, %v2039_v24  ;;  %4199 = vmatprep.mubr.msk.bf16.mxu1 %vm5529_vm0, %v5528_v1  ;;  %v848_v24 = vld [vmem:[%s5580_s22 + $0xab] sm:$0xff] }
 0x10e   : > { %4595 = vmatprep.mubr.msk.bf16.mxu0 %vm5529_vm0, %v5528_v1 }
 0x114   : > { %4200 = vmatmul.mubr.msk.bf16.gmra.mrb[44].mxu1 %vm290_vm1, %v197_v28 }
 0x115   : > { %4596 = vmatmul.mubr.msk.bf16.vlgmr.msra.gmra.mrb[0].mxu0 %vm290_vm1, %v5730_v25  ;;  %4203 = vmatprep.mubr.msk.bf16.mxu1 %vm5529_vm0, %v5528_v1  ;;  %v171_v25 = vld [vmem:[%s5580_s22 + $0xe1] sm:$0xff] }
 0x116   : > { %4680 = vmatpush3.bf16.msra.mxu0 %v5511_v29  ;;  %4599 = vmatprep.mubr.msk.bf16.mxu0 %vm5529_vm0, %v5528_v1  ;;  %v199_v39 = vpack.c.bf16 %v172_v36, %v171_v25  ;;  %v2421_v29 = vpack.c.bf16 %v2400_v27, %v2399_v26  ;;  %v851_v25 = vld [vmem:[%s5580_s22 + $0xc3] sm:$0xff]  ;;  %v852_v36 = vld [vmem:[%s5580_s22 + $0xcb] sm:$0xff] }
 0x117   : > { %4681 = vmatprep.subr.bf16.mxu0 %v5528_v1  ;;  %v2758_v26 = vld [vmem:[%s5580_s22 + $0xa6] sm:$0xff]  ;;  %v2759_v27 = vld [vmem:[%s5580_s22 + $0xae] sm:$0xff] }
 0x11a   : > { %4682 = vmatpush3.bf16.msra.mxu0 %v5513_v34 }
 0x11b   : > { %4767 = vmatprep.subr.bf16.mxu0 %v5528_v1 }
 0x11c   : > { %4204 = vmatmul.mubr.msk.bf16.gmra.mrb[48].mxu1 %vm290_vm1, %v198_v35  ;;  %v2422_v35 = vpack.c.bf16 %v2401_v33, %v2401_v33  ;;  %v868_v33 = vld [vmem:[%s5580_s22 + $0x14b] sm:$0xff] }
 0x11d   : > { %4600 = vmatmul.mubr.msk.bf16.gmra.mrb[4].mxu0 %vm290_vm1, %v5744_v31  ;;  %4207 = vmatprep.mubr.msk.bf16.mxu1 %vm5529_vm0, %v5528_v1  ;;  %v173_v31 = vld [vmem:[%s5580_s22 + $0xf1] sm:$0xff] }
 0x11e   : > { %4603 = vmatprep.mubr.msk.bf16.mxu0 %vm5529_vm0, %v5528_v1  ;;  %v200_v41 = vpack.c.bf16 %v174_v40, %v173_v31  ;;  %v2745_v31 = vld [vmem:[%s5580_s22 + $0x3e] sm:$0xff]  ;;  %v6229_v40 = vpack.c.bf16 %v852_v36, %v851_v25 }
 0x11f   : > { %v2761_v25 = vld [vmem:[%s5580_s22 + $0xbe] sm:$0xff] }
 0x124   : > { %4208 = vmatmul.mubr.msk.bf16.gmra.mrb[52].mxu1 %vm290_vm1, %v199_v39  ;;  %v2744_v39 = vld [vmem:[%s5580_s22 + $0x36] sm:$0xff] }
 0x125   : > { %4604 = vmatmul.mubr.msk.bf16.gmra.mrb[8].mxu0 %vm290_vm1, %v5757_v37  ;;  %4211 = vmatprep.mubr.msk.bf16.mxu1 %vm5529_vm0, %v5528_v1  ;;  %v175_v37 = vld [vmem:[%s5580_s22 + $0x101] sm:$0xff] }
 0x126   : > { %4607 = vmatprep.mubr.msk.bf16.mxu0 %vm5529_vm0, %v5528_v1  ;;  %v201_v44 = vpack.c.bf16 %v176_v42, %v175_v37  ;;  %v5515_v37 = vld [vmem:[%s6810_s1 + $0x80] sm:$0xff]   ;;  %v853_v42 = vld [vmem:[%s5580_s22 + $0xd3] sm:$0xff] }
 0x12c   : > { %4212 = vmatmul.mubr.msk.bf16.gmra.mrb[56].mxu1 %vm290_vm1, %v200_v41  ;;  %v2785_v41 = vpack.c.bf16 %v2745_v31, %v2744_v39  ;;  %v869_v31 = vld [vmem:[%s5580_s22 + $0x153] sm:$0xf] }
 0x12d   : > { %4608 = vmatmul.mubr.msk.bf16.gmra.mrb[12].mxu0 %vm290_vm1, %v5770_v43  ;;  %4215 = vmatprep.mubr.msk.bf16.mxu1 %vm5529_vm0, %v5528_v1  ;;  %v177_v43 = vld [vmem:[%s5580_s22 + $0x111] sm:$0xff] }
 0x12e   : > { %4611 = vmatprep.mubr.msk.bf16.mxu0 %vm5529_vm0, %v5528_v1  ;;  %v202_v47 = vpack.c.bf16 %v178_v46, %v177_v43  ;;  %v2746_v43 = vld [vmem:[%s5580_s22 + $0x46] sm:$0xff]  ;;  %v2747_v46 = vld [vmem:[%s5580_s22 + $0x4e] sm:$0xff] }
 0x134   : > { %4216 = vmatmul.mubr.msk.bf16.gmra.mrb[60].mxu1 %vm290_vm1, %v201_v44  ;;  %v854_v44 = vld [vmem:[%s5580_s22 + $0xdb] sm:$0xff] }
 0x135   : > { %4612 = vmatmul.mubr.msk.bf16.gmra.mrb[16].mxu0 %vm290_vm1, %v5783_v49  ;;  %4219 = vmatprep.mubr.msk.bf16.mxu1 %vm5529_vm0, %v5528_v1  ;;  %v179_v49 = vld [vmem:[%s5580_s22 + $0x121] sm:$0xff] }
 0x136   : > { %4615 = vmatprep.mubr.msk.bf16.mxu0 %vm5529_vm0, %v5528_v1  ;;  %v203_v50 = vpack.c.bf16 %v180_v48, %v179_v49  ;;  %v6249_v49 = vpack.c.bf16 %v854_v44, %v853_v42  ;;  %v2786_v48 = vpack.c.bf16 %v2747_v46, %v2746_v43  ;;  %v890_v42 = vpack.c.bf16 %v869_v31, %v869_v31  ;;  %v2764_v43 = vld [vmem:[%s5580_s22 + $0xd6] sm:$0xff]  ;;  %v2765_v46 = vld [vmem:[%s5580_s22 + $0xde] sm:$0xff] }
 0x137   : > { %v3142_v31 = vld [vmem:[%s5580_s22 + $0xaf] sm:$0xff] }
 0x13c   : > { %4220 = vmatmul.mubr.msk.bf16.gmra.mrb[64].mxu1 %vm290_vm1, %v202_v47  ;;  %v5517_v47 = vld [vmem:[%s6810_s1 + $0x88] sm:$0xff]  }
 0x13d   : > { %4616 = vmatmul.mubr.msk.bf16.gmra.mrb[20].mxu0 %vm290_vm1, %v5796_v55  ;;  %4223 = vmatprep.mubr.msk.bf16.mxu1 %vm5529_vm0, %v5528_v1  ;;  %v181_v55 = vld [vmem:[%s5580_s22 + $0x131] sm:$0xff] }
 0x13e   : > { %4619 = vmatprep.mubr.msk.bf16.mxu0 %vm5529_vm0, %v5528_v1  ;;  %v204_v53 = vpack.c.bf16 %v182_v51, %v181_v55  ;;  %v856_v55 = vld [vmem:[%s5580_s22 + $0xeb] sm:$0xff]  ;;  %v2748_v51 = vld [vmem:[%s5580_s22 + $0x56] sm:$0xff] }
 0x144   : > { %4224 = vmatmul.mubr.msk.bf16.gmra.mrb[68].mxu1 %vm290_vm1, %v203_v50  ;;  %v855_v50 = vld [vmem:[%s5580_s22 + $0xe3] sm:$0xff] }
 0x145   : > { %4620 = vmatmul.mubr.msk.bf16.gmra.mrb[24].mxu0 %vm290_vm1, %v5809_v61  ;;  %4227 = vmatprep.mubr.msk.bf16.mxu1 %vm5529_vm0, %v5528_v1  ;;  %v183_v61 = vld [vmem:[%s5580_s22 + $0x141] sm:$0xff] }
 0x146   : > { %4623 = vmatprep.mubr.msk.bf16.mxu0 %vm5529_vm0, %v5528_v1  ;;  %v205_v56 = vpack.c.bf16 %v184_v54, %v183_v61  ;;  %v6262_v61 = vpack.c.bf16 %v856_v55, %v855_v50  ;;  %v2767_v50 = vld [vmem:[%s5580_s22 + $0xee] sm:$0xff]  ;;  %v5518_v55 = vld [vmem:[%s6810_s1 + $0x40] sm:$0xff]  }
 0x14c   : > { %4228 = vmatmul.mubr.msk.bf16.gmra.mrb[72].mxu1 %vm290_vm1, %v204_v53  ;;  %v2749_v53 = vld [vmem:[%s5580_s22 + $0x5e] sm:$0xff] }
 0x14d   : > { %4624 = vmatmul.mubr.msk.bf16.gmra.mrb[28].mxu0 %vm290_vm1, %v5822_v4  ;;  %4231 = vmatprep.mubr.msk.bf16.mxu1 %vm5529_vm0, %v5528_v1  ;;  %v185_v4 = vld [vmem:[%s5580_s22 + $0x151] sm:$0xf]  ;;  %v2787_v54 = vpack.c.bf16 %v2749_v53, %v2748_v51  ;;  %v5519_v51 = vld [vmem:[%s6810_s1 + $0x48] sm:$0xff]   ;;  %v2768_v53 = vld [vmem:[%s5580_s22 + $0xf6] sm:$0xff] }
 0x14e   : > { %4627 = vmatprep.mubr.msk.bf16.mxu0 %vm5529_vm0, %v5528_v1  ;;  %v206_v57 = vpack.c.bf16 %v185_v4, %v185_v4  ;;  %v858_v4 = vld [vmem:[%s5580_s22 + $0xfb] sm:$0xff] }
 0x154   : > { %4232 = vmatmul.mubr.msk.bf16.gmra.mrb[76].mxu1 %vm290_vm1, %v205_v56  ;;  %v857_v56 = vld [vmem:[%s5580_s22 + $0xf3] sm:$0xff] }
 0x155   : > { %4628 = vmatmul.mubr.msk.bf16.gmra.mrb[32].mxu0 %vm290_vm1, %v5834_v9  ;;  %4235 = vmatprep.mubr.msk.bf16.mxu1 %vm5529_vm0, %v5528_v1  ;;  %v830_v9 = vld [vmem:[%s5580_s22 + $0x1b] sm:$0xff] }
 0x156   : > { %4631 = vmatprep.mubr.msk.bf16.mxu0 %vm5529_vm0, %v5528_v1  ;;  %v870_v60 = vpack.c.bf16 %v830_v9, %v829_v58  ;;  %v2751_v58 = vld [vmem:[%s5580_s22 + $0x6e] sm:$0xff]  ;;  %v6275_v9 = vpack.c.bf16 %v858_v4, %v857_v56 }
 0x157   : > { %v2771_v4 = vld [vmem:[%s5580_s22 + $0x10e] sm:$0xff] }
 0x15c   : > { %4236 = vmatmul.mubr.msk.bf16.gmra.mrb[80].mxu1 %vm290_vm1, %v206_v57  ;;  %v2750_v57 = vld [vmem:[%s5580_s22 + $0x66] sm:$0xff] }
 0x15d   : > { %4632 = vmatmul.mubr.msk.bf16.gmra.mrb[36].mxu0 %vm290_vm1, %v5847_v15  ;;  %4243 = vmatprep.mubr.msk.bf16.mxu1 %vm5529_vm0, %v5528_v1  ;;  %v831_v15 = vld [vmem:[%s5580_s22 + $0x23] sm:$0xff] }
 0x15e   : > { %4635 = vmatprep.mubr.msk.bf16.mxu0 %vm5529_vm0, %v5528_v1  ;;  %v6105_v2 = vpack.c.bf16 %v832_v63, %v831_v15  ;;  %v860_v15 = vld [vmem:[%s5580_s22 + $0x10b] sm:$0xff]  ;;  %v2752_v63 = vld [vmem:[%s5580_s22 + $0x76] sm:$0xff] }
 0x164   : > { %4244 = vmatmul.mubr.msk.bf16.vlgmr.msra.gmra.mrb[0].mxu1 %vm290_vm1, %v870_v60  ;;  %v2788_v60 = vpack.c.bf16 %v2751_v58, %v2750_v57  ;;  %v2773_v58 = vld [vmem:[%s5580_s22 + $0x11e] sm:$0xff] }
 0x165   : > { %4636 = vmatmul.mubr.msk.bf16.gmra.mrb[40].mxu0 %vm290_vm1, %v5867_v23  ;;  %4247 = vmatprep.mubr.msk.bf16.mxu1 %vm5529_vm0, %v5528_v1  ;;  %v833_v23 = vld [vmem:[%s5580_s22 + $0x33] sm:$0xff] }
 0x166   : > { %4639 = vmatprep.mubr.msk.bf16.mxu0 %vm5529_vm0, %v5528_v1  ;;  %4328 = vmatpush3.bf16.msra.mxu1 %v5514_v62  ;;  %v6118_v6 = vpack.c.bf16 %v834_v5, %v833_v23  ;;  %v859_v62 = vld [vmem:[%s5580_s22 + $0x103] sm:$0xff] }
 0x167   : > { %4329 = vmatprep.subr.bf16.mxu1 %v5528_v1  ;;  %v6288_v23 = vpack.c.bf16 %v860_v15, %v859_v62  ;;  %v2775_v62 = vld [vmem:[%s5580_s22 + $0x12e] sm:$0xff] }
 0x16a   : > { %4330 = vmatpush3.bf16.msra.mxu1 %v5516_v0  ;;  %v2753_v0 = vld [vmem:[%s5580_s22 + $0x7e] sm:$0xff] }
 0x16b   : > { %4855 = vmatprep.subr.bf16.mxu1 %v5528_v1  ;;  %v2789_v5 = vpack.c.bf16 %v2753_v0, %v2752_v63  ;;  %v2777_v63 = vld [vmem:[%s5580_s22 + $0x13e] sm:$0xff] }
 0x16c   : > { %4248 = vmatmul.mubr.msk.bf16.gmra.mrb[4].mxu1 %vm290_vm1, %v6105_v2 }
 0x16d   : > { %4640 = vmatmul.mubr.msk.bf16.gmra.mrb[44].mxu0 %vm290_vm1, %v5881_v30  ;;  %4251 = vmatprep.mubr.msk.bf16.mxu1 %vm5529_vm0, %v5528_v1  ;;  %v835_v30 = vld [vmem:[%s5580_s22 + $0x43] sm:$0xff] }
 0x16e   : > { %4643 = vmatprep.mubr.msk.bf16.mxu0 %vm5529_vm0, %v5528_v1  ;;  %v6130_v8 = vpack.c.bf16 %v836_v7, %v835_v30  ;;  %v861_v30 = vld [vmem:[%s5580_s22 + $0x113] sm:$0xff]  ;;  %v862_v7 = vld [vmem:[%s5580_s22 + $0x11b] sm:$0xff] }
 0x174   : > { %4252 = vmatmul.mubr.msk.bf16.gmra.mrb[8].mxu1 %vm290_vm1, %v6118_v6 }
 0x175   : > { %4644 = vmatmul.mubr.msk.bf16.gmra.mrb[48].mxu0 %vm290_vm1, %v5894_v38  ;;  %4255 = vmatprep.mubr.msk.bf16.mxu1 %vm5529_vm0, %v5528_v1  ;;  %v837_v38 = vld [vmem:[%s5580_s22 + $0x53] sm:$0xff] }
 0x176   : > { %4647 = vmatprep.mubr.msk.bf16.mxu0 %vm5529_vm0, %v5528_v1  ;;  %v6142_v12 = vpack.c.bf16 %v838_v10, %v837_v38  ;;  %v2754_v38 = vld [vmem:[%s5580_s22 + $0x86] sm:$0xff]  ;;  %v2755_v10 = vld [vmem:[%s5580_s22 + $0x8e] sm:$0xff] }
 0x17c   : > { %4256 = vmatmul.mubr.msk.bf16.gmra.mrb[12].mxu1 %vm290_vm1, %v6130_v8 }
 0x17d   : > { %4648 = vmatmul.mubr.msk.bf16.gmra.mrb[52].mxu0 %vm290_vm1, %v5907_v45  ;;  %4259 = vmatprep.mubr.msk.bf16.mxu1 %vm5529_vm0, %v5528_v1  ;;  %v839_v45 = vld [vmem:[%s5580_s22 + $0x63] sm:$0xff] }
 0x17e   : > { %4651 = vmatprep.mubr.msk.bf16.mxu0 %vm5529_vm0, %v5528_v1  ;;  %v6154_v14 = vpack.c.bf16 %v840_v13, %v839_v45  ;;  %v6301_v45 = vpack.c.bf16 %v862_v7, %v861_v30  ;;  %v2790_v13 = vpack.c.bf16 %v2755_v10, %v2754_v38  ;;  %v2781_v7 = vld [vmem:[%s5580_s22 + $0x15e] sm:$0xff]  ;;  %v2783_v10 = vld [vmem:[%s5580_s22 + $0x16e] sm:$0xff] }
 0x184   : > { %4260 = vmatmul.mubr.msk.bf16.gmra.mrb[16].mxu1 %vm290_vm1, %v6142_v12 }
 0x185   : > { %4652 = vmatmul.mubr.msk.bf16.gmra.mrb[56].mxu0 %vm290_vm1, %v5920_v52  ;;  %4263 = vmatprep.mubr.msk.bf16.mxu1 %vm5529_vm0, %v5528_v1  ;;  %v841_v52 = vld [vmem:[%s5580_s22 + $0x73] sm:$0xff] }
 0x186   : > { %4655 = vmatprep.mubr.msk.bf16.mxu0 %vm5529_vm0, %v5528_v1  ;;  %v6166_v17 = vpack.c.bf16 %v842_v16, %v841_v52  ;;  %v863_v52 = vld [vmem:[%s5580_s22 + $0x123] sm:$0xff]  ;;  %v864_v16 = vld [vmem:[%s5580_s22 + $0x12b] sm:$0xff] }
 0x18c   : > { %4264 = vmatmul.mubr.msk.bf16.gmra.mrb[20].mxu1 %vm290_vm1, %v6154_v14 }
 0x18d   : > { %4656 = vmatmul.mubr.msk.bf16.gmra.mrb[60].mxu0 %vm290_vm1, %v5933_v59  ;;  %4267 = vmatprep.mubr.msk.bf16.mxu1 %vm5529_vm0, %v5528_v1  ;;  %v843_v59 = vld [vmem:[%s5580_s22 + $0x83] sm:$0xff] }
 0x18e   : > { %4659 = vmatprep.mubr.msk.bf16.mxu0 %vm5529_vm0, %v5528_v1  ;;  %v6178_v20 = vpack.c.bf16 %v844_v19, %v843_v59  ;;  %v2756_v59 = vld [vmem:[%s5580_s22 + $0x96] sm:$0xff]  ;;  %v2757_v19 = vld [vmem:[%s5580_s22 + $0x9e] sm:$0xff] }
 0x194   : > { %4268 = vmatmul.mubr.msk.bf16.gmra.mrb[24].mxu1 %vm290_vm1, %v6166_v17 }
 0x195   : > { %4660 = vmatmul.mubr.msk.bf16.gmra.mrb[64].mxu0 %vm290_vm1, %v5946_v3  ;;  %4271 = vmatprep.mubr.msk.bf16.mxu1 %vm5529_vm0, %v5528_v1  ;;  %v845_v3 = vld [vmem:[%s5580_s22 + $0x93] sm:$0xff] }
 0x196   : > { %4663 = vmatprep.mubr.msk.bf16.mxu0 %vm5529_vm0, %v5528_v1  ;;  %v6190_v22 = vpack.c.bf16 %v846_v21, %v845_v3  ;;  %v6314_v3 = vpack.c.bf16 %v864_v16, %v863_v52  ;;  %v2791_v21 = vpack.c.bf16 %v2757_v19, %v2756_v59  ;;  %v3128_v16 = vld [vmem:[%s5580_s22 + $0x3f] sm:$0xff]  ;;  %v3130_v19 = vld [vmem:[%s5580_s22 + $0x4f] sm:$0xff] }
 0x19c   : > { %4272 = vmatmul.mubr.msk.bf16.gmra.mrb[28].mxu1 %vm290_vm1, %v6178_v20 }
 0x19d   : > { %4664 = vmatmul.mubr.msk.bf16.gmra.mrb[68].mxu0 %vm290_vm1, %v5959_v11  ;;  %4275 = vmatprep.mubr.msk.bf16.mxu1 %vm5529_vm0, %v5528_v1  ;;  %v847_v11 = vld [vmem:[%s5580_s22 + $0xa3] sm:$0xff] }
 0x19e   : > { %4667 = vmatprep.mubr.msk.bf16.mxu0 %vm5529_vm0, %v5528_v1  ;;  %v6204_v28 = vpack.c.bf16 %v848_v24, %v847_v11  ;;  %v865_v11 = vld [vmem:[%s5580_s22 + $0x133] sm:$0xff]  ;;  %v866_v24 = vld [vmem:[%s5580_s22 + $0x13b] sm:$0xff] }
 0x1a4   : > { %4276 = vmatmul.mubr.msk.bf16.gmra.mrb[32].mxu1 %vm290_vm1, %v6190_v22 }
 0x1a5   : > { %4668 = vmatmul.mubr.msk.bf16.gmra.mrb[72].mxu0 %vm290_vm1, %v5972_v18  ;;  %4279 = vmatprep.mubr.msk.bf16.mxu1 %vm5529_vm0, %v5528_v1  ;;  %v849_v18 = vld [vmem:[%s5580_s22 + $0xb3] sm:$0xff] }
 0x1a6   : > { %4671 = vmatprep.mubr.msk.bf16.mxu0 %vm5529_vm0, %v5528_v1  ;;  %v6216_v34 = vpack.c.bf16 %v850_v32, %v849_v18  ;;  %v2792_v18 = vpack.c.bf16 %v2759_v27, %v2758_v26  ;;  %v867_v32 = vld [vmem:[%s5580_s22 + $0x143] sm:$0xff]  ;;  %v3134_v26 = vld [vmem:[%s5580_s22 + $0x6f] sm:$0xff] }
 0x1a7   : > { %v6340_v36 = vpack.c.bf16 %v868_v33, %v867_v32  ;;  %v3138_v33 = vld [vmem:[%s5580_s22 + $0x8f] sm:$0xff] }
 0x1ac   : > { %4280 = vmatmul.mubr.msk.bf16.gmra.mrb[36].mxu1 %vm290_vm1, %v6204_v28 }
 0x1ad   : > { %4672 = vmatmul.mubr.msk.bf16.gmra.mrb[76].mxu0 %vm290_vm1, %v2421_v29  ;;  %4283 = vmatprep.mubr.msk.bf16.mxu1 %vm5529_vm0, %v5528_v1  ;;  %v6327_v29 = vpack.c.bf16 %v866_v24, %v865_v11  ;;  %v3132_v11 = vld [vmem:[%s5580_s22 + $0x5f] sm:$0xff] }
 0x1ae   : > { %4675 = vmatprep.mubr.msk.bf16.mxu0 %vm5529_vm0, %v5528_v1 }
 0x1b4   : > { %4284 = vmatmul.mubr.msk.bf16.gmra.mrb[40].mxu1 %vm290_vm1, %v6216_v34 }
 0x1b5   : > { %4676 = vmatmul.mubr.msk.bf16.gmra.mrb[80].mxu0 %vm290_vm1, %v2422_v35  ;;  %4287 = vmatprep.mubr.msk.bf16.mxu1 %vm5529_vm0, %v5528_v1  ;;  %v2760_v35 = vld [vmem:[%s5580_s22 + $0xb6] sm:$0xff] }
 0x1b6   : > { %4683 = vmatprep.mubr.msk.bf16.mxu0 %vm5529_vm0, %v5528_v1  ;;  %v2793_v39 = vpack.c.bf16 %v2761_v25, %v2760_v35  ;;  %v3140_v25 = vld [vmem:[%s5580_s22 + $0x9f] sm:$0xff] }
 0x1bc   : > { %4288 = vmatmul.mubr.msk.bf16.gmra.mrb[44].mxu1 %vm290_vm1, %v6229_v40 }
 0x1bd   : > { %4684 = vmatmul.mubr.msk.bf16.vlgmr.msra.gmra.mrb[0].mxu0 %vm290_vm1, %v2785_v41  ;;  %4291 = vmatprep.mubr.msk.bf16.mxu1 %vm5529_vm0, %v5528_v1  ;;  %v2762_v41 = vld [vmem:[%s5580_s22 + $0xc6] sm:$0xff] }
 0x1be   : > { %4768 = vmatpush3.bf16.msra.mxu0 %v5515_v37  ;;  %4687 = vmatprep.mubr.msk.bf16.mxu0 %vm5529_vm0, %v5528_v1  ;;  %v2763_v37 = vld [vmem:[%s5580_s22 + $0xce] sm:$0xff] }
 0x1bf   : > { %4769 = vmatprep.subr.bf16.mxu0 %v5528_v1  ;;  %v2794_v44 = vpack.c.bf16 %v2763_v37, %v2762_v41  ;;  %v1251_v37 = vld [vmem:[%s5580_s22 + $0x15b] sm:$0xff] }
 0x1c2   : > { %4770 = vmatpush3.bf16.msra.mxu0 %v5517_v47  ;;  %v2795_v47 = vpack.c.bf16 %v2765_v46, %v2764_v43 }
 0x1c4   : > { %4292 = vmatmul.mubr.msk.bf16.gmra.mrb[48].mxu1 %vm290_vm1, %v6249_v49 }
 0x1c5   : > { %4688 = vmatmul.mubr.msk.bf16.gmra.mrb[4].mxu0 %vm290_vm1, %v2786_v48  ;;  %4295 = vmatprep.mubr.msk.bf16.mxu1 %vm5529_vm0, %v5528_v1  ;;  %v2766_v48 = vld [vmem:[%s5580_s22 + $0xe6] sm:$0xff] }
 0x1c6   : > { %4691 = vmatprep.mubr.msk.bf16.mxu0 %vm5529_vm0, %v5528_v1 }
 0x1cc   : > { %4296 = vmatmul.mubr.msk.bf16.gmra.mrb[52].mxu1 %vm290_vm1, %v6262_v61 }
 0x1cd   : > { %4692 = vmatmul.mubr.msk.bf16.gmra.mrb[8].mxu0 %vm290_vm1, %v2787_v54  ;;  %4299 = vmatprep.mubr.msk.bf16.mxu1 %vm5529_vm0, %v5528_v1  ;;  %v2769_v54 = vld [vmem:[%s5580_s22 + $0xfe] sm:$0xff] }
 0x1ce   : > { %4695 = vmatprep.mubr.msk.bf16.mxu0 %vm5529_vm0, %v5528_v1  ;;  %v2797_v56 = vpack.c.bf16 %v2769_v54, %v2768_v53  ;;  %v3147_v53 = vld [vmem:[%s5580_s22 + $0xd7] sm:$0xff]  ;;  %v3148_v54 = vld [vmem:[%s5580_s22 + $0xdf] sm:$0xff] }
 0x1d4   : > { %4300 = vmatmul.mubr.msk.bf16.gmra.mrb[56].mxu1 %vm290_vm1, %v6275_v9 }
 0x1d5   : > { %4696 = vmatmul.mubr.msk.bf16.gmra.mrb[12].mxu0 %vm290_vm1, %v2788_v60  ;;  %4303 = vmatprep.mubr.msk.bf16.mxu1 %vm5529_vm0, %v5528_v1 }
 0x1d6   : > { %4699 = vmatprep.mubr.msk.bf16.mxu0 %vm5529_vm0, %v5528_v1 }
 0x1dc   : > { %4304 = vmatmul.mubr.msk.bf16.gmra.mrb[60].mxu1 %vm290_vm1, %v6288_v23 }
 0x1dd   : > { %4700 = vmatmul.mubr.msk.bf16.gmra.mrb[16].mxu0 %vm290_vm1, %v2789_v5  ;;  %4307 = vmatprep.mubr.msk.bf16.mxu1 %vm5529_vm0, %v5528_v1  ;;  %v2779_v5 = vld [vmem:[%s5580_s22 + $0x14e] sm:$0xff] }
 0x1de   : > { %4703 = vmatprep.mubr.msk.bf16.mxu0 %vm5529_vm0, %v5528_v1 }
 0x1e4   : > { %4308 = vmatmul.mubr.msk.bf16.gmra.mrb[64].mxu1 %vm290_vm1, %v6301_v45 }
 0x1e5   : > { %4704 = vmatmul.mubr.msk.bf16.gmra.mrb[20].mxu0 %vm290_vm1, %v2790_v13  ;;  %4311 = vmatprep.mubr.msk.bf16.mxu1 %vm5529_vm0, %v5528_v1 }
 0x1e6   : > { %4707 = vmatprep.mubr.msk.bf16.mxu0 %vm5529_vm0, %v5528_v1 }
 0x1ec   : > { %4312 = vmatmul.mubr.msk.bf16.gmra.mrb[68].mxu1 %vm290_vm1, %v6314_v3 }
 0x1ed   : > { %4708 = vmatmul.mubr.msk.bf16.gmra.mrb[24].mxu0 %vm290_vm1, %v2791_v21  ;;  %4315 = vmatprep.mubr.msk.bf16.mxu1 %vm5529_vm0, %v5528_v1 }
 0x1ee   : > { %4711 = vmatprep.mubr.msk.bf16.mxu0 %vm5529_vm0, %v5528_v1 }
 0x1f4   : > { %4316 = vmatmul.mubr.msk.bf16.gmra.mrb[72].mxu1 %vm290_vm1, %v6327_v29 }
 0x1f5   : > { %4712 = vmatmul.mubr.msk.bf16.gmra.mrb[28].mxu0 %vm290_vm1, %v2792_v18  ;;  %4319 = vmatprep.mubr.msk.bf16.mxu1 %vm5529_vm0, %v5528_v1  ;;  %v3136_v18 = vld [vmem:[%s5580_s22 + $0x7f] sm:$0xff] }
 0x1f6   : > { %4715 = vmatprep.mubr.msk.bf16.mxu0 %vm5529_vm0, %v5528_v1 }
 0x1fc   : > { %4320 = vmatmul.mubr.msk.bf16.gmra.mrb[76].mxu1 %vm290_vm1, %v6340_v36 }
 0x1fd   : > { %4716 = vmatmul.mubr.msk.bf16.gmra.mrb[32].mxu0 %vm290_vm1, %v2793_v39  ;;  %4323 = vmatprep.mubr.msk.bf16.mxu1 %vm5529_vm0, %v5528_v1 }
 0x1fe   : > { %4719 = vmatprep.mubr.msk.bf16.mxu0 %vm5529_vm0, %v5528_v1 }
 0x204   : > { %4324 = vmatmul.mubr.msk.bf16.gmra.mrb[80].mxu1 %vm290_vm1, %v890_v42  ;;  %v3143_v42 = vld [vmem:[%s5580_s22 + $0xb7] sm:$0xff] }
 0x205   : > { %4720 = vmatmul.mubr.msk.bf16.gmra.mrb[36].mxu0 %vm290_vm1, %v2794_v44  ;;  %4331 = vmatprep.mubr.msk.bf16.mxu1 %vm5529_vm0, %v5528_v1  ;;  %v3144_v44 = vld [vmem:[%s5580_s22 + $0xbf] sm:$0xff] }
 0x206   : > { %4723 = vmatprep.mubr.msk.bf16.mxu0 %vm5529_vm0, %v5528_v1  ;;  %v3176_v46 = vpack.c.bf16 %v3144_v44, %v3143_v42 }
 0x20c   : > { %4332 = vmatmul.mubr.msk.bf16.vlgmr.msra.gmra.mrb[0].mxu1 %vm290_vm1, %v6105_v2  ;;  %v2796_v2 = vpack.c.bf16 %v2767_v50, %v2766_v48  ;;  %v3146_v48 = vld [vmem:[%s5580_s22 + $0xcf] sm:$0xff] }
 0x20d   : > { %4724 = vmatmul.mubr.msk.bf16.gmra.mrb[40].mxu0 %vm290_vm1, %v2795_v47  ;;  %4335 = vmatprep.mubr.msk.bf16.mxu1 %vm5529_vm0, %v5528_v1  ;;  %v3145_v47 = vld [vmem:[%s5580_s22 + $0xc7] sm:$0xff] }
 0x20e   : > { %4727 = vmatprep.mubr.msk.bf16.mxu0 %vm5529_vm0, %v5528_v1  ;;  %4857 = vmatpush3.bf16.msra.mxu1 %v5518_v55  ;;  %v3177_v55 = vpack.c.bf16 %v3146_v48, %v3145_v47  ;;  %v3164_v47 = vld [vmem:[%s5580_s22 + $0x15f] sm:$0xff] }
 0x20f   : > { %4856 = vmatprep.subr.bf16.mxu1 %v5528_v1 }
 0x212   : > { %4858 = vmatpush3.bf16.msra.mxu1 %v5519_v51  ;;  %v1618_v51 = vld [vmem:[%s5580_s22 + $0xdc] sm:$0xff] }
 0x214   : > { %4336 = vmatmul.mubr.msk.bf16.gmra.mrb[4].mxu1 %vm290_vm1, %v6118_v6  ;;  %v2770_v6 = vld [vmem:[%s5580_s22 + $0x106] sm:$0xff] }
 0x215   : > { %4728 = vmatmul.mubr.msk.bf16.gmra.mrb[44].mxu0 %vm290_vm1, %v2796_v2  ;;  %4339 = vmatprep.mubr.msk.bf16.mxu1 %vm5529_vm0, %v5528_v1  ;;  %v2798_v57 = vpack.c.bf16 %v2771_v4, %v2770_v6  ;;  %v1617_v2 = vld [vmem:[%s5580_s22 + $0xd4] sm:$0xff]  ;;  %v3178_v6 = vpack.c.bf16 %v3148_v54, %v3147_v53  ;;  %v1619_v4 = vld [vmem:[%s5580_s22 + $0xe4] sm:$0xff] }
 0x216   : > { %4731 = vmatprep.mubr.msk.bf16.mxu0 %vm5529_vm0, %v5528_v1  ;;  %v1635_v54 = vld [vmem:[%s5580_s22 + $0x164] sm:$0xf] }
 0x21c   : > { %4340 = vmatmul.mubr.msk.bf16.gmra.mrb[8].mxu1 %vm290_vm1, %v6130_v8  ;;  %v2772_v8 = vld [vmem:[%s5580_s22 + $0x116] sm:$0xff] }
 0x21d   : > { %4732 = vmatmul.mubr.msk.bf16.gmra.mrb[48].mxu0 %vm290_vm1, %v2797_v56  ;;  %4343 = vmatprep.mubr.msk.bf16.mxu1 %vm5529_vm0, %v5528_v1  ;;  %v2799_v60 = vpack.c.bf16 %v2773_v58, %v2772_v8  ;;  %v1647_v56 = vpack.c.bf16 %v1618_v51, %v1617_v2  ;;  %v3149_v8 = vld [vmem:[%s5580_s22 + $0xe7] sm:$0xff]  ;;  %v3150_v58 = vld [vmem:[%s5580_s22 + $0xef] sm:$0xff] }
 0x21e   : > { %4735 = vmatprep.mubr.msk.bf16.mxu0 %vm5529_vm0, %v5528_v1 }
 0x224   : > { %4344 = vmatmul.mubr.msk.bf16.gmra.mrb[12].mxu1 %vm290_vm1, %v6142_v12  ;;  %v2774_v12 = vld [vmem:[%s5580_s22 + $0x126] sm:$0xff] }
 0x225   : > { %4736 = vmatmul.mubr.msk.bf16.gmra.mrb[52].mxu0 %vm290_vm1, %v2798_v57  ;;  %4347 = vmatprep.mubr.msk.bf16.mxu1 %vm5529_vm0, %v5528_v1  ;;  %v2800_v15 = vpack.c.bf16 %v2775_v62, %v2774_v12  ;;  %v1620_v57 = vld [vmem:[%s5580_s22 + $0xec] sm:$0xff]  ;;  %v3179_v12 = vpack.c.bf16 %v3150_v58, %v3149_v8  ;;  %v1621_v62 = vld [vmem:[%s5580_s22 + $0xf4] sm:$0xff]  ;;  %v1656_v8 = vpack.c.bf16 %v1635_v54, %v1635_v54 }
 0x226   : > { %4739 = vmatprep.mubr.msk.bf16.mxu0 %vm5529_vm0, %v5528_v1 }
 0x22c   : > { %4348 = vmatmul.mubr.msk.bf16.gmra.mrb[16].mxu1 %vm290_vm1, %v6154_v14  ;;  %v2776_v14 = vld [vmem:[%s5580_s22 + $0x136] sm:$0xff] }
 0x22d   : > { %4740 = vmatmul.mubr.msk.bf16.gmra.mrb[56].mxu0 %vm290_vm1, %v2799_v60  ;;  %4351 = vmatprep.mubr.msk.bf16.mxu1 %vm5529_vm0, %v5528_v1  ;;  %v2801_v0 = vpack.c.bf16 %v2777_v63, %v2776_v14  ;;  %v1648_v60 = vpack.c.bf16 %v1620_v57, %v1619_v4  ;;  %v3151_v14 = vld [vmem:[%s5580_s22 + $0xf7] sm:$0xff]  ;;  %v3152_v63 = vld [vmem:[%s5580_s22 + $0xff] sm:$0xff] }
 0x22e   : > { %4743 = vmatprep.mubr.msk.bf16.mxu0 %vm5529_vm0, %v5528_v1 }
 0x234   : > { %4352 = vmatmul.mubr.msk.bf16.gmra.mrb[20].mxu1 %vm290_vm1, %v6166_v17  ;;  %v2778_v17 = vld [vmem:[%s5580_s22 + $0x146] sm:$0xff] }
 0x235   : > { %4744 = vmatmul.mubr.msk.bf16.gmra.mrb[60].mxu0 %vm290_vm1, %v2800_v15  ;;  %4355 = vmatprep.mubr.msk.bf16.mxu1 %vm5529_vm0, %v5528_v1  ;;  %v2802_v30 = vpack.c.bf16 %v2779_v5, %v2778_v17  ;;  %v1622_v15 = vld [vmem:[%s5580_s22 + $0xfc] sm:$0xff]  ;;  %v3180_v17 = vpack.c.bf16 %v3152_v63, %v3151_v14  ;;  %v1623_v5 = vld [vmem:[%s5580_s22 + $0x104] sm:$0xff] }
 0x236   : > { %4747 = vmatprep.mubr.msk.bf16.mxu0 %vm5529_vm0, %v5528_v1 }
 0x23c   : > { %4356 = vmatmul.mubr.msk.bf16.gmra.mrb[24].mxu1 %vm290_vm1, %v6178_v20  ;;  %v2780_v20 = vld [vmem:[%s5580_s22 + $0x156] sm:$0xff] }
 0x23d   : > { %4748 = vmatmul.mubr.msk.bf16.gmra.mrb[64].mxu0 %vm290_vm1, %v2801_v0  ;;  %4359 = vmatprep.mubr.msk.bf16.mxu1 %vm5529_vm0, %v5528_v1  ;;  %v2803_v38 = vpack.c.bf16 %v2781_v7, %v2780_v20  ;;  %v1649_v0 = vpack.c.bf16 %v1622_v15, %v1621_v62  ;;  %v3153_v20 = vld [vmem:[%s5580_s22 + $0x107] sm:$0xff]  ;;  %v3154_v7 = vld [vmem:[%s5580_s22 + $0x10f] sm:$0xff]  ;;  %v3167_v62 = vld [vmem:[%s5580_s22 + $0x177] sm:$0xf] }
 0x23e   : > { %4751 = vmatprep.mubr.msk.bf16.mxu0 %vm5529_vm0, %v5528_v1 }
 0x244   : > { %4360 = vmatmul.mubr.msk.bf16.gmra.mrb[28].mxu1 %vm290_vm1, %v6190_v22  ;;  %v2782_v22 = vld [vmem:[%s5580_s22 + $0x166] sm:$0xff] }
 0x245   : > { %4752 = vmatmul.mubr.msk.bf16.gmra.mrb[68].mxu0 %vm290_vm1, %v2802_v30  ;;  %4363 = vmatprep.mubr.msk.bf16.mxu1 %vm5529_vm0, %v5528_v1  ;;  %v2804_v13 = vpack.c.bf16 %v2783_v10, %v2782_v22  ;;  %v1624_v30 = vld [vmem:[%s5580_s22 + $0x10c] sm:$0xff]  ;;  %v3181_v22 = vpack.c.bf16 %v3154_v7, %v3153_v20  ;;  %v1625_v10 = vld [vmem:[%s5580_s22 + $0x114] sm:$0xff] }
 0x246   : > { %4755 = vmatprep.mubr.msk.bf16.mxu0 %vm5529_vm0, %v5528_v1 }
 0x24c   : > { %4364 = vmatmul.mubr.msk.bf16.gmra.mrb[32].mxu1 %vm290_vm1, %v6204_v28  ;;  %v2784_v28 = vld [vmem:[%s5580_s22 + $0x176] sm:$0xf] }
 0x24d   : > { %4756 = vmatmul.mubr.msk.bf16.gmra.mrb[72].mxu0 %vm290_vm1, %v2803_v38  ;;  %4367 = vmatprep.mubr.msk.bf16.mxu1 %vm5529_vm0, %v5528_v1  ;;  %v2805_v52 = vpack.c.bf16 %v2784_v28, %v2784_v28  ;;  %v1650_v38 = vpack.c.bf16 %v1624_v30, %v1623_v5  ;;  %v3155_v28 = vld [vmem:[%s5580_s22 + $0x117] sm:$0xff] }
 0x24e   : > { %4759 = vmatprep.mubr.msk.bf16.mxu0 %vm5529_vm0, %v5528_v1 }
 0x254   : > { %4368 = vmatmul.mubr.msk.bf16.gmra.mrb[36].mxu1 %vm290_vm1, %v6216_v34  ;;  %v3127_v34 = vld [vmem:[%s5580_s22 + $0x37] sm:$0xff] }
 0x255   : > { %4760 = vmatmul.mubr.msk.bf16.gmra.mrb[76].mxu0 %vm290_vm1, %v2804_v13  ;;  %4371 = vmatprep.mubr.msk.bf16.mxu1 %vm5529_vm0, %v5528_v1  ;;  %v3168_v59 = vpack.c.bf16 %v3128_v16, %v3127_v34  ;;  %v1626_v13 = vld [vmem:[%s5580_s22 + $0x11c] sm:$0xff] }
 0x256   : > { %4763 = vmatprep.mubr.msk.bf16.mxu0 %vm5529_vm0, %v5528_v1  ;;  %v1651_v34 = vpack.c.bf16 %v1626_v13, %v1625_v10 }
 0x25c   : > { %4372 = vmatmul.mubr.msk.bf16.gmra.mrb[40].mxu1 %vm290_vm1, %v6229_v40  ;;  %v3129_v40 = vld [vmem:[%s5580_s22 + $0x47] sm:$0xff] }
 0x25d   : > { %4764 = vmatmul.mubr.msk.bf16.gmra.mrb[80].mxu0 %vm290_vm1, %v2805_v52  ;;  %4375 = vmatprep.mubr.msk.bf16.mxu1 %vm5529_vm0, %v5528_v1  ;;  %v3169_v21 = vpack.c.bf16 %v3130_v19, %v3129_v40  ;;  %v3156_v52 = vld [vmem:[%s5580_s22 + $0x11f] sm:$0xff]  ;;  %v1628_v40 = vld [vmem:[%s5580_s22 + $0x12c] sm:$0xff] }
 0x25e   : > { %4771 = vmatprep.mubr.msk.bf16.mxu0 %vm5529_vm0, %v5528_v1  ;;  %v3182_v16 = vpack.c.bf16 %v3156_v52, %v3155_v28  ;;  %v3157_v19 = vld [vmem:[%s5580_s22 + $0x127] sm:$0xff] }
 0x264   : > { %4376 = vmatmul.mubr.msk.bf16.gmra.mrb[44].mxu1 %vm290_vm1, %v6249_v49  ;;  %v3131_v49 = vld [vmem:[%s5580_s22 + $0x57] sm:$0xff] }
 0x265   : > { %4772 = vmatmul.mubr.msk.bf16.vlgmr.msra.gmra.mrb[0].mxu0 %vm290_vm1, %v3168_v59  ;;  %4379 = vmatprep.mubr.msk.bf16.mxu1 %vm5529_vm0, %v5528_v1  ;;  %v3170_v24 = vpack.c.bf16 %v3132_v11, %v3131_v49  ;;  %v1627_v59 = vld [vmem:[%s5580_s22 + $0x124] sm:$0xff] }
 0x266   : > { %4775 = vmatprep.mubr.msk.bf16.mxu0 %vm5529_vm0, %v5528_v1  ;;  %v1652_v49 = vpack.c.bf16 %v1628_v40, %v1627_v59 }
 0x26c   : > { %4380 = vmatmul.mubr.msk.bf16.gmra.mrb[48].mxu1 %vm290_vm1, %v6262_v61  ;;  %v3133_v61 = vld [vmem:[%s5580_s22 + $0x67] sm:$0xff] }
 0x26d   : > { %4776 = vmatmul.mubr.msk.bf16.gmra.mrb[4].mxu0 %vm290_vm1, %v3169_v21  ;;  %4383 = vmatprep.mubr.msk.bf16.mxu1 %vm5529_vm0, %v5528_v1  ;;  %v3171_v27 = vpack.c.bf16 %v3134_v26, %v3133_v61  ;;  %v3158_v21 = vld [vmem:[%s5580_s22 + $0x12f] sm:$0xff]  ;;  %v1630_v61 = vld [vmem:[%s5580_s22 + $0x13c] sm:$0xff] }
 0x26e   : > { %4779 = vmatprep.mubr.msk.bf16.mxu0 %vm5529_vm0, %v5528_v1  ;;  %v3183_v11 = vpack.c.bf16 %v3158_v21, %v3157_v19  ;;  %v3159_v26 = vld [vmem:[%s5580_s22 + $0x137] sm:$0xff] }
 0x274   : > { %4384 = vmatmul.mubr.msk.bf16.gmra.mrb[52].mxu1 %vm290_vm1, %v6275_v9  ;;  %v3135_v9 = vld [vmem:[%s5580_s22 + $0x77] sm:$0xff] }
 0x275   : > { %4780 = vmatmul.mubr.msk.bf16.gmra.mrb[8].mxu0 %vm290_vm1, %v3170_v24  ;;  %4387 = vmatprep.mubr.msk.bf16.mxu1 %vm5529_vm0, %v5528_v1  ;;  %v3172_v32 = vpack.c.bf16 %v3136_v18, %v3135_v9  ;;  %v1629_v24 = vld [vmem:[%s5580_s22 + $0x134] sm:$0xff] }
 0x276   : > { %4783 = vmatprep.mubr.msk.bf16.mxu0 %vm5529_vm0, %v5528_v1 }
 0x27c   : > { %4388 = vmatmul.mubr.msk.bf16.gmra.mrb[56].mxu1 %vm290_vm1, %v6288_v23  ;;  %v3137_v23 = vld [vmem:[%s5580_s22 + $0x87] sm:$0xff] }
 0x27d   : > { %4784 = vmatmul.mubr.msk.bf16.gmra.mrb[12].mxu0 %vm290_vm1, %v3171_v27  ;;  %4391 = vmatprep.mubr.msk.bf16.mxu1 %vm5529_vm0, %v5528_v1  ;;  %v3173_v35 = vpack.c.bf16 %v3138_v33, %v3137_v23  ;;  %v3160_v27 = vld [vmem:[%s5580_s22 + $0x13f] sm:$0xff] }
 0x27e   : > { %4787 = vmatprep.mubr.msk.bf16.mxu0 %vm5529_vm0, %v5528_v1  ;;  %v3184_v33 = vpack.c.bf16 %v3160_v27, %v3159_v26 }
 0x284   : > { %4392 = vmatmul.mubr.msk.bf16.gmra.mrb[60].mxu1 %vm290_vm1, %v6301_v45  ;;  %v3139_v45 = vld [vmem:[%s5580_s22 + $0x97] sm:$0xff] }
 0x285   : > { %4788 = vmatmul.mubr.msk.bf16.gmra.mrb[16].mxu0 %vm290_vm1, %v3172_v32  ;;  %4395 = vmatprep.mubr.msk.bf16.mxu1 %vm5529_vm0, %v5528_v1  ;;  %v3174_v39 = vpack.c.bf16 %v3140_v25, %v3139_v45  ;;  %v1653_v32 = vpack.c.bf16 %v1630_v61, %v1629_v24  ;;  %v1631_v45 = vld [vmem:[%s5580_s22 + $0x144] sm:$0xff]  ;;  %v1632_v25 = vld [vmem:[%s5580_s22 + $0x14c] sm:$0xff] }
 0x286   : > { %4791 = vmatprep.mubr.msk.bf16.mxu0 %vm5529_vm0, %v5528_v1 }
 0x28c   : > { %4396 = vmatmul.mubr.msk.bf16.gmra.mrb[64].mxu1 %vm290_vm1, %v6314_v3  ;;  %v3141_v3 = vld [vmem:[%s5580_s22 + $0xa7] sm:$0xff] }
 0x28d   : > { %4792 = vmatmul.mubr.msk.bf16.gmra.mrb[20].mxu0 %vm290_vm1, %v3173_v35  ;;  %4399 = vmatprep.mubr.msk.bf16.mxu1 %vm5529_vm0, %v5528_v1  ;;  %v3175_v41 = vpack.c.bf16 %v3142_v31, %v3141_v3  ;;  %v3162_v3 = vld [vmem:[%s5580_s22 + $0x14f] sm:$0xff] }
 0x28e   : > { %4795 = vmatprep.mubr.msk.bf16.mxu0 %vm5529_vm0, %v5528_v1 }
 0x294   : > { %4400 = vmatmul.mubr.msk.bf16.gmra.mrb[68].mxu1 %vm290_vm1, %v6327_v29  ;;  %v1250_v29 = vld [vmem:[%s5580_s22 + $0x153] sm:$0xff] }
 0x295   : > { %4796 = vmatmul.mubr.msk.bf16.gmra.mrb[24].mxu0 %vm290_vm1, %v3174_v39  ;;  %4403 = vmatprep.mubr.msk.bf16.mxu1 %vm5529_vm0, %v5528_v1  ;;  %v1272_v43 = vpack.c.bf16 %v1251_v37, %v1250_v29  ;;  %v3161_v39 = vld [vmem:[%s5580_s22 + $0x147] sm:$0xff]  ;;  %v1654_v29 = vpack.c.bf16 %v1632_v25, %v1631_v45 }
 0x296   : > { %4799 = vmatprep.mubr.msk.bf16.mxu0 %vm5529_vm0, %v5528_v1  ;;  %v3185_v42 = vpack.c.bf16 %v3162_v3, %v3161_v39 }
 0x29c   : > { %4404 = vmatmul.mubr.msk.bf16.gmra.mrb[72].mxu1 %vm290_vm1, %v6340_v36  ;;  %v1252_v36 = vld [vmem:[%s5580_s22 + $0x163] sm:$0xf] }
 0x29d   : > { %4800 = vmatmul.mubr.msk.bf16.gmra.mrb[28].mxu0 %vm290_vm1, %v3175_v41  ;;  %4407 = vmatprep.mubr.msk.bf16.mxu1 %vm5529_vm0, %v5528_v1  ;;  %v1273_v50 = vpack.c.bf16 %v1252_v36, %v1252_v36  ;;  %v3163_v36 = vld [vmem:[%s5580_s22 + $0x157] sm:$0xff] }
 0x29e   : > { %4803 = vmatprep.mubr.msk.bf16.mxu0 %vm5529_vm0, %v5528_v1  ;;  %v3186_v51 = vpack.c.bf16 %v3164_v47, %v3163_v36 }
 0x2a4   : > { %4408 = vmatmul.mubr.msk.bf16.gmra.mrb[76].mxu1 %vm290_vm1, %v1272_v43  ;;  %v1633_v43 = vld [vmem:[%s5580_s22 + $0x154] sm:$0xff] }
 0x2a5   : > { %4804 = vmatmul.mubr.msk.bf16.gmra.mrb[32].mxu0 %vm290_vm1, %v3176_v46  ;;  %4411 = vmatprep.mubr.msk.bf16.mxu1 %vm5529_vm0, %v5528_v1  ;;  %v1634_v46 = vld [vmem:[%s5580_s22 + $0x15c] sm:$0xff] }
 0x2a6   : > { %4807 = vmatprep.mubr.msk.bf16.mxu0 %vm5529_vm0, %v5528_v1 }
 0x2ac   : > { %4412 = vmatmul.mubr.msk.bf16.gmra.mrb[80].mxu1 %vm290_vm1, %v1273_v50 }
 0x2ad   : > { %4808 = vmatmul.mubr.msk.bf16.gmra.mrb[36].mxu0 %vm290_vm1, %v3177_v55  ;;  %4463 = vmatprep.mubr.msk.bf16.mxu1 %vm5529_vm0, %v5528_v1  ;;  %v1655_v55 = vpack.c.bf16 %v1634_v46, %v1633_v43 }
 0x2ae   : > { %4811 = vmatprep.mubr.msk.bf16.mxu0 %vm5529_vm0, %v5528_v1 }
 0x2b4   : > { %4464 = vmatmul.mubr.msk.bf16.vlgmr.msra.gmra.mrb[44].mxu1 %vm290_vm1, %v1647_v56  ;;  %v3165_v56 = vld [vmem:[%s5580_s22 + $0x167] sm:$0xff] }
 0x2b5   : > { %4812 = vmatmul.mubr.msk.bf16.gmra.mrb[40].mxu0 %vm290_vm1, %v3178_v6  ;;  %4467 = vmatprep.mubr.msk.bf16.mxu1 %vm5529_vm0, %v5528_v1  ;;  %v3166_v6 = vld [vmem:[%s5580_s22 + $0x16f] sm:$0xff]  ;;  %s5489_s22 = smul.u32 328, %s6813_s10 }
 0x2b6   : > { %4815 = vmatprep.mubr.msk.bf16.mxu0 %vm5529_vm0, %v5528_v1 }
 0x2b7   : > { %s6701_s4 = scalar_lea.vmem %s6811_s2, %s5489_s22 }
 0x2bc   : > { %4468 = vmatmul.mubr.msk.bf16.gmra.mrb[48].mxu1 %vm290_vm1, %v1648_v60  ;;  %v3187_v60 = vpack.c.bf16 %v3166_v6, %v3165_v56 }
 0x2bd   : > { %4816 = vmatmul.mubr.msk.bf16.gmra.mrb[44].mxu0 %vm290_vm1, %v3179_v12  ;;  %4471 = vmatprep.mubr.msk.bf16.mxu1 %vm5529_vm0, %v5528_v1 }
 0x2be   : > { %4819 = vmatprep.mubr.msk.bf16.mxu0 %vm5529_vm0, %v5528_v1 }
 0x2c4   : > { %4472 = vmatmul.mubr.msk.bf16.gmra.mrb[52].mxu1 %vm290_vm1, %v1649_v0  ;;  %v3188_v0 = vpack.c.bf16 %v3167_v62, %v3167_v62 }
 0x2c5   : > { %4820 = vmatmul.mubr.msk.bf16.gmra.mrb[48].mxu0 %vm290_vm1, %v3180_v17  ;;  %4475 = vmatprep.mubr.msk.bf16.mxu1 %vm5529_vm0, %v5528_v1 }
 0x2c6   : > { %4823 = vmatprep.mubr.msk.bf16.mxu0 %vm5529_vm0, %v5528_v1 }
 0x2cc   : > { %4476 = vmatmul.mubr.msk.bf16.gmra.mrb[56].mxu1 %vm290_vm1, %v1650_v38 }
 0x2cd   : > { %4824 = vmatmul.mubr.msk.bf16.gmra.mrb[52].mxu0 %vm290_vm1, %v3181_v22  ;;  %4479 = vmatprep.mubr.msk.bf16.mxu1 %vm5529_vm0, %v5528_v1 }
 0x2ce   : > { %4827 = vmatprep.mubr.msk.bf16.mxu0 %vm5529_vm0, %v5528_v1 }
 0x2d4   : > { %4480 = vmatmul.mubr.msk.bf16.gmra.mrb[60].mxu1 %vm290_vm1, %v1651_v34 }
 0x2d5   : > { %4828 = vmatmul.mubr.msk.bf16.gmra.mrb[56].mxu0 %vm290_vm1, %v3182_v16  ;;  %4483 = vmatprep.mubr.msk.bf16.mxu1 %vm5529_vm0, %v5528_v1 }
 0x2d6   : > { %4831 = vmatprep.mubr.msk.bf16.mxu0 %vm5529_vm0, %v5528_v1 }
 0x2dc   : > { %4484 = vmatmul.mubr.msk.bf16.gmra.mrb[64].mxu1 %vm290_vm1, %v1652_v49 }
 0x2dd   : > { %4832 = vmatmul.mubr.msk.bf16.gmra.mrb[60].mxu0 %vm290_vm1, %v3183_v11  ;;  %4487 = vmatprep.mubr.msk.bf16.mxu1 %vm5529_vm0, %v5528_v1 }
 0x2de   : > { %4835 = vmatprep.mubr.msk.bf16.mxu0 %vm5529_vm0, %v5528_v1 }
 0x2df   : > { %v6618_v9 = vpop.f32.mrb[0].mxu1 }
 0x2e0   : > { %v4333_v18 = vpop.f32.mrb[1].mxu1 }
 0x2e1   : > { %v6620_v23 = vpop.f32.mrb[2].mxu1 }
 0x2e2   : > { %v4334_v35 = vpop.f32.mrb[3].mxu1 }
 0x2e4   : > { %4488 = vmatmul.mubr.msk.bf16.gmra.mrb[68].mxu1 %vm290_vm1, %v1653_v32 }
 0x2e5   : > { %4836 = vmatmul.mubr.msk.bf16.gmra.mrb[64].mxu0 %vm290_vm1, %v3184_v33  ;;  %4491 = vmatprep.mubr.msk.bf16.mxu1 %vm5529_vm0, %v5528_v1 }
 0x2e6   : > { %4839 = vmatprep.mubr.msk.bf16.mxu0 %vm5529_vm0, %v5528_v1 }
 0x2e7   : > { %v6632_v31 = vpop.f32.mrb[4].mxu1 }
 0x2e8   : > { %v4337_v41 = vpop.f32.mrb[5].mxu1 }
 0x2e9   : > { %v6634_v37 = vpop.f32.mrb[6].mxu1 }
 0x2ea   : > { %v4338_v44 = vpop.f32.mrb[7].mxu1 }
 0x2ec   : > { %4492 = vmatmul.mubr.msk.bf16.gmra.mrb[72].mxu1 %vm290_vm1, %v1654_v29 }
 0x2ed   : > { %4840 = vmatmul.mubr.msk.bf16.gmra.mrb[68].mxu0 %vm290_vm1, %v3185_v42  ;;  %4495 = vmatprep.mubr.msk.bf16.mxu1 %vm5529_vm0, %v5528_v1 }
 0x2ee   : > { %4843 = vmatprep.mubr.msk.bf16.mxu0 %vm5529_vm0, %v5528_v1 }
 0x2ef   : > { %v6646_v48 = vpop.f32.mrb[8].mxu1 }
 0x2f0   : > { %v4341_v50 = vpop.f32.mrb[9].mxu1 }
 0x2f1   : > { %v6648_v2 = vpop.f32.mrb[10].mxu1 }
 0x2f2   : > { %v4342_v53 = vpop.f32.mrb[11].mxu1 }
 0x2f4   : > { %4496 = vmatmul.mubr.msk.bf16.gmra.mrb[76].mxu1 %vm290_vm1, %v1655_v55 }
 0x2f5   : > { %4844 = vmatmul.mubr.msk.bf16.gmra.mrb[72].mxu0 %vm290_vm1, %v3186_v51  ;;  %4499 = vmatprep.mubr.msk.bf16.mxu1 %vm5529_vm0, %v5528_v1 }
 0x2f6   : > { %4847 = vmatprep.mubr.msk.bf16.mxu0 %vm5529_vm0, %v5528_v1 }
 0x2f7   : > { %v6659_v4 = vpop.f32.mrb[12].mxu1 }
 0x2f8   : > { %v4345_v57 = vpop.f32.mrb[13].mxu1 }
 0x2f9   : > { %v6661_v58 = vpop.f32.mrb[14].mxu1 }
 0x2fa   : > { %v4346_v12 = vpop.f32.mrb[15].mxu1 }
 0x2fc   : > { %4500 = vmatmul.mubr.msk.bf16.gmra.mrb[80].mxu1 %vm290_vm1, %v1656_v8 }
 0x2fd   : > { %4848 = vmatmul.mubr.msk.bf16.gmra.mrb[76].mxu0 %vm290_vm1, %v3187_v60 }
 0x2fe   : > { %4851 = vmatprep.mubr.msk.bf16.mxu0 %vm5529_vm0, %v5528_v1 }
 0x2ff   : > { %v6668_v15 = vpop.f32.mrb[16].mxu1 }
 0x300   : > { %v4349_v14 = vpop.f32.mrb[17].mxu1 }
 0x301   : > { %v6670_v63 = vpop.f32.mrb[18].mxu1 }
 0x302   : > { %v4350_v17 = vpop.f32.mrb[19].mxu1 }
 0x305   : > { %4852 = vmatmul.mubr.msk.bf16.gmra.mrb[80].mxu0 %vm290_vm1, %v3188_v0 }
 0x307   : > { %v6673_v5 = vpop.f32.mrb[20].mxu1 }
 0x308   : > { %v4353_v30 = vpop.f32.mrb[21].mxu1 }
 0x309   : > { %v6675_v20 = vpop.f32.mrb[22].mxu1 }
 0x30a   : > { %v4354_v7 = vpop.f32.mrb[23].mxu1 }
 0x30f   : > { %v6677_v38 = vpop.f32.mrb[24].mxu1 }
 0x310   : > { %v4357_v22 = vpop.f32.mrb[25].mxu1 }
 0x311   : > { %v6679_v1 = vpop.f32.mrb[26].mxu1 }
 0x312   : > { %v4358_v10 = vpop.f32.mrb[27].mxu1 }
 0x317   : > { %v6681_v13 = vpop.f32.mrb[28].mxu1 }
 0x318   : > { %v4361_v28 = vpop.f32.mrb[29].mxu1 }
 0x319   : > { %v6683_v52 = vpop.f32.mrb[30].mxu1 }
 0x31a   : > { %v4362_v34 = vpop.f32.mrb[31].mxu1 }
 0x31f   : > { %v6685_v16 = vpop.f32.mrb[32].mxu1 }
 0x320   : > { %v4365_v59 = vpop.f32.mrb[33].mxu1 }
 0x321   : > { %v6687_v40 = vpop.f32.mrb[34].mxu1 }
 0x322   : > { %v4366_v19 = vpop.f32.mrb[35].mxu1 }
 0x327   : > { %v6689_v21 = vpop.f32.mrb[36].mxu1 }
 0x328   : > { %v4369_v49 = vpop.f32.mrb[37].mxu1 }
 0x329   : > { %v6691_v11 = vpop.f32.mrb[38].mxu1 }
 0x32a   : > { %v4370_v24 = vpop.f32.mrb[39].mxu1 }
 0x32f   : > { %v6693_v61 = vpop.f32.mrb[40].mxu1 }
 0x330   : > { %v4373_v26 = vpop.f32.mrb[41].mxu1 }
 0x331   : > { %v6695_v27 = vpop.f32.mrb[42].mxu1 }
 0x332   : > { %v4374_v18 = vpop.f32.mrb[43].mxu1 }
 0x338   : > { %v3303_v32 = vpop.f32.mrb[0].mxu0 }
 0x339   : > { %v4859_v33 = vadd.f32 %v3303_v32, %v6618_v9  ;;  %v4773_v35 = vpop.f32.mrb[1].mxu0 }
 0x33a   : > { %v3306_v45 = vpop.f32.mrb[2].mxu0 }
 0x33b   : > { %3511 = vst.msk [vmem:[%s6701_s4] sm:$0xff] %vm3510_vm2, %v4859_v33  ;;  %v4860_v25 = vadd.f32 %v3306_v45, %v6620_v23  ;;  %v4774_v39 = vpop.f32.mrb[3].mxu0 }
 0x33d   : > { %3512 = vst.msk [vmem:[%s6701_s4 + $0x8] sm:$0xff] %vm3510_vm2, %v4860_v25 }
 0x340   : > { %v3311_v3 = vpop.f32.mrb[4].mxu0 }
 0x341   : > { %v4861_v41 = vadd.f32 %v3311_v3, %v6632_v31  ;;  %v4777_v29 = vpop.f32.mrb[5].mxu0 }
 0x342   : > { %v3314_v42 = vpop.f32.mrb[6].mxu0 }
 0x343   : > { %3513 = vst.msk [vmem:[%s6701_s4 + $0x10] sm:$0xff] %vm3510_vm2, %v4861_v41  ;;  %v4862_v9 = vadd.f32 %v3314_v42, %v6634_v37  ;;  %v4778_v44 = vpop.f32.mrb[7].mxu0 }
 0x345   : > { %3514 = vst.msk [vmem:[%s6701_s4 + $0x18] sm:$0xff] %vm3510_vm2, %v4862_v9 }
 0x348   : > { %v3319_v43 = vpop.f32.mrb[8].mxu0 }
 0x349   : > { %v4863_v23 = vadd.f32 %v3319_v43, %v6646_v48  ;;  %v4781_v46 = vpop.f32.mrb[9].mxu0 }
 0x34a   : > { %v3322_v36 = vpop.f32.mrb[10].mxu0 }
 0x34b   : > { %3515 = vst.msk [vmem:[%s6701_s4 + $0x20] sm:$0xff] %vm3510_vm2, %v4863_v23  ;;  %v4864_v31 = vadd.f32 %v3322_v36, %v6648_v2  ;;  %v4782_v47 = vpop.f32.mrb[11].mxu0 }
 0x34d   : > { %3516 = vst.msk [vmem:[%s6701_s4 + $0x28] sm:$0xff] %vm3510_vm2, %v4864_v31 }
 0x350   : > { %v3327_v50 = vpop.f32.mrb[12].mxu0 }
 0x351   : > { %v4865_v37 = vadd.f32 %v3327_v50, %v6659_v4  ;;  %v4785_v55 = vpop.f32.mrb[13].mxu0 }
 0x352   : > { %v3330_v51 = vpop.f32.mrb[14].mxu0 }
 0x353   : > { %3517 = vst.msk [vmem:[%s6701_s4 + $0x30] sm:$0xff] %vm3510_vm2, %v4865_v37  ;;  %v4866_v48 = vadd.f32 %v3330_v51, %v6661_v58  ;;  %v4786_v53 = vpop.f32.mrb[15].mxu0 }
 0x355   : > { %3518 = vst.msk [vmem:[%s6701_s4 + $0x38] sm:$0xff] %vm3510_vm2, %v4866_v48 }
 0x358   : > { %v3335_v54 = vpop.f32.mrb[16].mxu0 }
 0x359   : > { %v4867_v2 = vadd.f32 %v3335_v54, %v6668_v15  ;;  %v4789_v56 = vpop.f32.mrb[17].mxu0 }
 0x35a   : > { %v3338_v6 = vpop.f32.mrb[18].mxu0 }
 0x35b   : > { %3519 = vst.msk [vmem:[%s6701_s4 + $0x40] sm:$0xff] %vm3510_vm2, %v4867_v2  ;;  %v4868_v4 = vadd.f32 %v3338_v6, %v6670_v63  ;;  %v4790_v57 = vpop.f32.mrb[19].mxu0 }
 0x35d   : > { %3520 = vst.msk [vmem:[%s6701_s4 + $0x48] sm:$0xff] %vm3510_vm2, %v4868_v4 }
 0x360   : > { %v3343_v8 = vpop.f32.mrb[20].mxu0 }
 0x361   : > { %v4869_v58 = vadd.f32 %v3343_v8, %v6673_v5  ;;  %v4793_v60 = vpop.f32.mrb[21].mxu0 }
 0x362   : > { %v3346_v12 = vpop.f32.mrb[22].mxu0 }
 0x363   : > { %3521 = vst.msk [vmem:[%s6701_s4 + $0x50] sm:$0xff] %vm3510_vm2, %v4869_v58  ;;  %v4870_v62 = vadd.f32 %v3346_v12, %v6675_v20  ;;  %v4794_v15 = vpop.f32.mrb[23].mxu0 }
 0x365   : > { %3522 = vst.msk [vmem:[%s6701_s4 + $0x58] sm:$0xff] %vm3510_vm2, %v4870_v62 }
 0x368   : > { %v3351_v14 = vpop.f32.mrb[24].mxu0 }
 0x369   : > { %v4871_v63 = vadd.f32 %v3351_v14, %v6677_v38  ;;  %v4797_v0 = vpop.f32.mrb[25].mxu0 }
 0x36a   : > { %v3354_v17 = vpop.f32.mrb[26].mxu0 }
 0x36b   : > { %3523 = vst.msk [vmem:[%s6701_s4 + $0x60] sm:$0xff] %vm3510_vm2, %v4871_v63  ;;  %v4872_v5 = vadd.f32 %v3354_v17, %v6679_v1  ;;  %v4798_v30 = vpop.f32.mrb[27].mxu0 }
 0x36d   : > { %3524 = vst.msk [vmem:[%s6701_s4 + $0x68] sm:$0xff] %vm3510_vm2, %v4872_v5 }
 0x370   : > { %v3359_v7 = vpop.f32.mrb[28].mxu0 }
 0x371   : > { %v4873_v20 = vadd.f32 %v3359_v7, %v6681_v13  ;;  %v4801_v22 = vpop.f32.mrb[29].mxu0 }
 0x372   : > { %v3362_v10 = vpop.f32.mrb[30].mxu0 }
 0x373   : > { %3525 = vst.msk [vmem:[%s6701_s4 + $0x70] sm:$0xff] %vm3510_vm2, %v4873_v20  ;;  %v4874_v38 = vadd.f32 %v3362_v10, %v6683_v52  ;;  %v4802_v28 = vpop.f32.mrb[31].mxu0 }
 0x375   : > { %3526 = vst.msk [vmem:[%s6701_s4 + $0x78] sm:$0xff] %vm3510_vm2, %v4874_v38 }
 0x378   : > { %v3367_v34 = vpop.f32.mrb[32].mxu0 }
 0x379   : > { %v4875_v1 = vadd.f32 %v3367_v34, %v6685_v16  ;;  %v4805_v59 = vpop.f32.mrb[33].mxu0 }
 0x37a   : > { %v3370_v19 = vpop.f32.mrb[34].mxu0 }
 0x37b   : > { %3527 = vst.msk [vmem:[%s6701_s4 + $0x80] sm:$0xff] %vm3510_vm2, %v4875_v1  ;;  %v4876_v13 = vadd.f32 %v3370_v19, %v6687_v40  ;;  %v4806_v49 = vpop.f32.mrb[35].mxu0 }
 0x37d   : > { %3528 = vst.msk [vmem:[%s6701_s4 + $0x88] sm:$0xff] %vm3510_vm2, %v4876_v13 }
 0x380   : > { %v3375_v24 = vpop.f32.mrb[36].mxu0 }
 0x381   : > { %v4877_v52 = vadd.f32 %v3375_v24, %v6689_v21  ;;  %v4809_v26 = vpop.f32.mrb[37].mxu0 }
 0x382   : > { %v3378_v18 = vpop.f32.mrb[38].mxu0 }
 0x383   : > { %3529 = vst.msk [vmem:[%s6701_s4 + $0x90] sm:$0xff] %vm3510_vm2, %v4877_v52  ;;  %v4878_v16 = vadd.f32 %v3378_v18, %v6691_v11  ;;  %v4810_v32 = vpop.f32.mrb[39].mxu0 }
 0x385   : > { %3530 = vst.msk [vmem:[%s6701_s4 + $0x98] sm:$0xff] %vm3510_vm2, %v4878_v16 }
 0x387   : > { %v1859_v33 = vpop.f32.mrb[44].mxu1 }
 0x388   : > { %v3383_v35 = vpop.f32.mrb[40].mxu0  ;;  %v4465_v40 = vpop.f32.mrb[45].mxu1 }
 0x389   : > { %v4879_v45 = vadd.f32 %v3383_v35, %v6693_v61  ;;  %v4813_v25 = vpop.f32.mrb[41].mxu0  ;;  %v1862_v39 = vpop.f32.mrb[46].mxu1 }
 0x38a   : > { %v3386_v3 = vpop.f32.mrb[42].mxu0  ;;  %v4466_v21 = vpop.f32.mrb[47].mxu1 }
 0x38b   : > { %3531 = vst.msk [vmem:[%s6701_s4 + $0xa0] sm:$0xff] %vm3510_vm2, %v4879_v45  ;;  %v4880_v41 = vadd.f32 %v3386_v3, %v6695_v27  ;;  %v4814_v29 = vpop.f32.mrb[43].mxu0 }
 0x38d   : > { %3532 = vst.msk [vmem:[%s6701_s4 + $0xa8] sm:$0xff] %vm3510_vm2, %v4880_v41 }
 0x38f   : > { %v1867_v11 = vpop.f32.mrb[48].mxu1 }
 0x390   : > { %v3391_v42 = vpop.f32.mrb[44].mxu0  ;;  %v4469_v9 = vpop.f32.mrb[49].mxu1 }
 0x391   : > { %v4881_v44 = vadd.f32 %v3391_v42, %v1859_v33  ;;  %v4817_v43 = vpop.f32.mrb[45].mxu0  ;;  %v1870_v61 = vpop.f32.mrb[50].mxu1 }
 0x392   : > { %v3394_v23 = vpop.f32.mrb[46].mxu0  ;;  %v4470_v46 = vpop.f32.mrb[51].mxu1 }
 0x393   : > { %3533 = vst.msk [vmem:[%s6701_s4 + $0xb0] sm:$0xff] %vm3510_vm2, %v4881_v44  ;;  %v4882_v36 = vadd.f32 %v3394_v23, %v1862_v39  ;;  %v4818_v31 = vpop.f32.mrb[47].mxu0 }
 0x395   : > { %3534 = vst.msk [vmem:[%s6701_s4 + $0xb8] sm:$0xff] %vm3510_vm2, %v4882_v36 }
 0x397   : > { %v1875_v27 = vpop.f32.mrb[52].mxu1 }
 0x398   : > { %v3399_v47 = vpop.f32.mrb[48].mxu0  ;;  %v4473_v50 = vpop.f32.mrb[53].mxu1 }
 0x399   : > { %v4883_v37 = vadd.f32 %v3399_v47, %v1867_v11  ;;  %v4821_v55 = vpop.f32.mrb[49].mxu0  ;;  %v1878_v51 = vpop.f32.mrb[54].mxu1 }
 0x39a   : > { %v3402_v48 = vpop.f32.mrb[50].mxu0  ;;  %v4474_v53 = vpop.f32.mrb[55].mxu1 }
 0x39b   : > { %3535 = vst.msk [vmem:[%s6701_s4 + $0xc0] sm:$0xff] %vm3510_vm2, %v4883_v37  ;;  %v4884_v54 = vadd.f32 %v3402_v48, %v1870_v61  ;;  %v4822_v2 = vpop.f32.mrb[51].mxu0 }
 0x39d   : > { %3536 = vst.msk [vmem:[%s6701_s4 + $0xc8] sm:$0xff] %vm3510_vm2, %v4884_v54 }
 0x39f   : > { %v1883_v56 = vpop.f32.mrb[56].mxu1 }
 0x3a0   : > { %v3407_v6 = vpop.f32.mrb[52].mxu0  ;;  %v4477_v4 = vpop.f32.mrb[57].mxu1 }
 0x3a1   : > { %v4885_v57 = vadd.f32 %v3407_v6, %v1875_v27  ;;  %v4825_v8 = vpop.f32.mrb[53].mxu0  ;;  %v1886_v58 = vpop.f32.mrb[58].mxu1 }
 0x3a2   : > { %v3410_v60 = vpop.f32.mrb[54].mxu0  ;;  %v4478_v12 = vpop.f32.mrb[59].mxu1 }
 0x3a3   : > { %3537 = vst.msk [vmem:[%s6701_s4 + $0xd0] sm:$0xff] %vm3510_vm2, %v4885_v57  ;;  %v4886_v62 = vadd.f32 %v3410_v60, %v1878_v51  ;;  %v4826_v15 = vpop.f32.mrb[55].mxu0 }
 0x3a5   : > { %3538 = vst.msk [vmem:[%s6701_s4 + $0xd8] sm:$0xff] %vm3510_vm2, %v4886_v62 }
 0x3a7   : > { %v1891_v14 = vpop.f32.mrb[60].mxu1 }
 0x3a8   : > { %v3415_v63 = vpop.f32.mrb[56].mxu0  ;;  %v4481_v0 = vpop.f32.mrb[61].mxu1 }
 0x3a9   : > { %v4887_v17 = vadd.f32 %v3415_v63, %v1883_v56  ;;  %v4829_v5 = vpop.f32.mrb[57].mxu0  ;;  %v1894_v30 = vpop.f32.mrb[62].mxu1 }
 0x3aa   : > { %v3418_v7 = vpop.f32.mrb[58].mxu0  ;;  %v4482_v20 = vpop.f32.mrb[63].mxu1 }
 0x3ab   : > { %3539 = vst.msk [vmem:[%s6701_s4 + $0xe0] sm:$0xff] %vm3510_vm2, %v4887_v17  ;;  %v4888_v22 = vadd.f32 %v3418_v7, %v1886_v58  ;;  %v4830_v10 = vpop.f32.mrb[59].mxu0 }
 0x3ad   : > { %3540 = vst.msk [vmem:[%s6701_s4 + $0xe8] sm:$0xff] %vm3510_vm2, %v4888_v22 }
 0x3af   : > { %v1899_v38 = vpop.f32.mrb[64].mxu1 }
 0x3b0   : > { %v3423_v28 = vpop.f32.mrb[60].mxu0  ;;  %v4485_v34 = vpop.f32.mrb[65].mxu1 }
 0x3b1   : > { %v4889_v1 = vadd.f32 %v3423_v28, %v1891_v14  ;;  %v4833_v59 = vpop.f32.mrb[61].mxu0  ;;  %v1902_v19 = vpop.f32.mrb[66].mxu1 }
 0x3b2   : > { %v3426_v13 = vpop.f32.mrb[62].mxu0  ;;  %v4486_v49 = vpop.f32.mrb[67].mxu1 }
 0x3b3   : > { %3541 = vst.msk [vmem:[%s6701_s4 + $0xf0] sm:$0xff] %vm3510_vm2, %v4889_v1  ;;  %v4890_v24 = vadd.f32 %v3426_v13, %v1894_v30  ;;  %v4834_v52 = vpop.f32.mrb[63].mxu0 }
 0x3b5   : > { %3542 = vst.msk [vmem:[%s6701_s4 + $0xf8] sm:$0xff] %vm3510_vm2, %v4890_v24 }
 0x3b7   : > { %v1907_v26 = vpop.f32.mrb[68].mxu1 }
 0x3b8   : > { %v3431_v18 = vpop.f32.mrb[64].mxu0  ;;  %v4489_v16 = vpop.f32.mrb[69].mxu1 }
 0x3b9   : > { %v4891_v32 = vadd.f32 %v3431_v18, %v1899_v38  ;;  %v4837_v33 = vpop.f32.mrb[65].mxu0  ;;  %v1910_v35 = vpop.f32.mrb[70].mxu1 }
 0x3ba   : > { %v3434_v40 = vpop.f32.mrb[66].mxu0  ;;  %v4490_v45 = vpop.f32.mrb[71].mxu1 }
 0x3bb   : > { %3543 = vst.msk [vmem:[%s6701_s4 + $0x100] sm:$0xff] %vm3510_vm2, %v4891_v32  ;;  %v4892_v25 = vadd.f32 %v3434_v40, %v1902_v19  ;;  %v4838_v39 = vpop.f32.mrb[67].mxu0 }
 0x3bd   : > { %3544 = vst.msk [vmem:[%s6701_s4 + $0x108] sm:$0xff] %vm3510_vm2, %v4892_v25 }
 0x3bf   : > { %v1915_v3 = vpop.f32.mrb[72].mxu1 }
 0x3c0   : > { %v3439_v21 = vpop.f32.mrb[68].mxu0  ;;  %v4493_v41 = vpop.f32.mrb[73].mxu1 }
 0x3c1   : > { %v4893_v29 = vadd.f32 %v3439_v21, %v1907_v26  ;;  %v4841_v11 = vpop.f32.mrb[69].mxu0  ;;  %v1918_v42 = vpop.f32.mrb[74].mxu1 }
 0x3c2   : > { %v3442_v9 = vpop.f32.mrb[70].mxu0  ;;  %v4494_v44 = vpop.f32.mrb[75].mxu1 }
 0x3c3   : > { %3545 = vst.msk [vmem:[%s6701_s4 + $0x110] sm:$0xff] %vm3510_vm2, %v4893_v29  ;;  %v4894_v43 = vadd.f32 %v3442_v9, %v1910_v35  ;;  %v4842_v61 = vpop.f32.mrb[71].mxu0 }
 0x3c5   : > { %3546 = vst.msk [vmem:[%s6701_s4 + $0x118] sm:$0xff] %vm3510_vm2, %v4894_v43 }
 0x3c7   : > { %v1923_v23 = vpop.f32.mrb[76].mxu1 }
 0x3c8   : > { %v3447_v46 = vpop.f32.mrb[72].mxu0  ;;  %v4497_v36 = vpop.f32.mrb[77].mxu1 }
 0x3c9   : > { %v4895_v31 = vadd.f32 %v3447_v46, %v1915_v3  ;;  %v4845_v27 = vpop.f32.mrb[73].mxu0  ;;  %v1926_v47 = vpop.f32.mrb[78].mxu1 }
 0x3ca   : > { %v3450_v50 = vpop.f32.mrb[74].mxu0  ;;  %v4498_v37 = vpop.f32.mrb[79].mxu1 }
 0x3cb   : > { %3547 = vst.msk [vmem:[%s6701_s4 + $0x120] sm:$0xff] %vm3510_vm2, %v4895_v31  ;;  %v4896_v55 = vadd.f32 %v3450_v50, %v1918_v42  ;;  %v4846_v51 = vpop.f32.mrb[75].mxu0 }
 0x3cd   : > { %3548 = vst.msk [vmem:[%s6701_s4 + $0x128] sm:$0xff] %vm3510_vm2, %v4896_v55 }
 0x3cf   : > { %v1931_v48 = vpop.f32.mrb[80].mxu1 }
 0x3d0   : > { %v3455_v53 = vpop.f32.mrb[76].mxu0  ;;  %v4501_v54 = vpop.f32.mrb[81].mxu1 }
 0x3d1   : > { %v4897_v2 = vadd.f32 %v3455_v53, %v1923_v23  ;;  %v4849_v56 = vpop.f32.mrb[77].mxu0  ;;  %v1934_v6 = vpop.f32.mrb[82].mxu1 }
 0x3d2   : > { %v3458_v4 = vpop.f32.mrb[78].mxu0  ;;  %v4502_v57 = vpop.f32.mrb[83].mxu1 }
 0x3d3   : > { %3549 = vst.msk [vmem:[%s6701_s4 + $0x130] sm:$0xff] %vm3510_vm2, %v4897_v2  ;;  %v4898_v8 = vadd.f32 %v3458_v4, %v1926_v47  ;;  %v4850_v58 = vpop.f32.mrb[79].mxu0 }
 0x3d5   : > { %3550 = vst.msk [vmem:[%s6701_s4 + $0x138] sm:$0xff] %vm3510_vm2, %v4898_v8 }
 0x3d8   : > { %v3463_v60 = vpop.f32.mrb[80].mxu0 }
 0x3d9   : > { %v4899_v12 = vadd.f32 %v3463_v60, %v1931_v48  ;;  %v4853_v62 = vpop.f32.mrb[81].mxu0 }
 0x3da   : > { %v3466_v15 = vpop.f32.mrb[82].mxu0 }
 0x3db   : > { %3552 = vst.msk [vmem:[%s6701_s4 + $0x140] sm:$0xf] %vm3551_vm3, %v4899_v12  ;;  %v4854_v14 = vpop.f32.mrb[83].mxu0 }
 0x3dc PF: > { %s12_s9 = sadd.s32 1, %s5526_s9  }
 0x3dd   : > { %p9_p4 = scmp.ge.s32.totalorder %s12_s9, 4  }
 0x3df   :  { %11 = sbr.rel (!%p9_p4) target bundleno = 1 (0x1), region = 66 }

</bundles_post_ra>
